<compile_context>
chip_gen: v7x
topology: tpu7x:2x2x1
jax: 0.10.0
libtpu: 0.0.40
codegen_flags: <defaults>
</compile_context>

<pallas_src>
import jax
import jax.numpy as jnp
from jax.experimental import pallas as pl
from jax.experimental.pallas import tpu as pltpu

EPS = 1e-5
_LANES = 128
_CHUNK = 32                # sublane rows per inner-loop chunk (4 f32 vregs/slice)
_MAX_ROWS_PER_TILE = 512   # 512x128 lanes -> ~7 MiB double-buffered footprint


def _fused_kernel(p_ref, x_ref, o_ref):
    # p_ref : (48,) SMEM scalar-prefetch params, row-major (8 out-ch x 6):
    #         [w0, w1, w2, bias, bn_scale, bn_shift]
    # x_ref : (6, rt, 128) VMEM tile; channels 0..2 = padded x1, 3..5 = padded x2
    # o_ref : (8, rt, 128) VMEM tile
    # Hoist all 48 scalar reads out of the chunk loop.
    w = [[p_ref[o * 6 + c] for c in range(3)] for o in range(8)]
    bias = [p_ref[o * 6 + 3] for o in range(8)]
    scale = [p_ref[o * 6 + 4] for o in range(8)]
    shift = [p_ref[o * 6 + 5] for o in range(8)]

    rt = x_ref.shape[1]
    n_chunks = rt // _CHUNK

    def chunk_body(ci, carry):
        r0 = ci * _CHUNK
        if not isinstance(r0, int):
            r0 = pl.multiple_of(r0, _CHUNK)
        a0 = x_ref[0, pl.ds(r0, _CHUNK), :]
        a1 = x_ref[1, pl.ds(r0, _CHUNK), :]
        a2 = x_ref[2, pl.ds(r0, _CHUNK), :]
        b0 = x_ref[3, pl.ds(r0, _CHUNK), :]
        b1 = x_ref[4, pl.ds(r0, _CHUNK), :]
        b2 = x_ref[5, pl.ds(r0, _CHUNK), :]
        for o in range(8):  # unrolled over the 8 output channels (VPU FMAs)
            v1 = w[o][0] * a0 + w[o][1] * a1 + w[o][2] * a2 + bias[o]
            v3 = w[o][0] * b0 + w[o][1] * b1 + w[o][2] * b2 + bias[o]
            v7 = v3 * scale[o] + shift[o]        # bn2(v3), affine folded
            v4 = jnp.maximum(v3, 0.0)            # relu(v3)
            o_ref[o, pl.ds(r0, _CHUNK), :] = v4 * v4 * v4 + v3 - v1 * v7
        return carry

    if n_chunks == 1:
        chunk_body(0, 0)
    else:
        jax.lax.fori_loop(0, n_chunks, chunk_body, 0)


def _tiling(rows):
    # Big streaming tiles (up to _MAX_ROWS_PER_TILE rows); for small problems
    # the whole thing is a single tile, rounded up to a chunk multiple.
    n_tiles = max(1, -(-rows // _MAX_ROWS_PER_TILE))
    rt = -(-rows // n_tiles)
    rt = -(-rt // _CHUNK) * _CHUNK
    return rt, n_tiles


@jax.jit
def model_forward(x1, x2, w1, b1, gamma2, beta2):
    """x1, x2: (N, 3, H, W) float32 -> (N, 8, H+2, W+2) float32."""
    N, C, H, W = x1.shape
    Hp, Wp = H + 2, W + 2
    M = N * Hp * Wp                     # padded pixel count (BN divisor)
    rows = -(-M // _LANES)
    rt, n_tiles = _tiling(rows)
    r_pad = rt * n_tiles

    def prep(x):
        # conv padding=1 zero-pad, channels-first flatten, lane-align pad;
        # fused by XLA under jit into a single copy per input.
        xp = jnp.pad(x, ((0, 0), (0, 0), (1, 1), (1, 1)))
        xc = jnp.transpose(xp, (1, 0, 2, 3)).reshape(C, M)
        xc = jnp.pad(xc, ((0, 0), (0, r_pad * _LANES - M)))
        return xc.reshape(C, r_pad, _LANES)

    x12 = jnp.concatenate([prep(x1), prep(x2)], axis=0)    # (6, r_pad, 128)

    # ---- BN2 batch statistics of v3 = conv1(x2), analytic (no extra pass) ---
    # Sums/covariance use the UNPADDED x2 (zero padding adds nothing to them);
    # the divisor M counts the padded pixels, matching PyTorch training-mode
    # BN over the (H+2)x(W+2) conv output (bias cancels in the variance).
    n_real = N * H * W
    xc2 = jnp.transpose(x2, (1, 0, 2, 3)).reshape(C, n_real)
    mu = jnp.sum(xc2, axis=1) / M                            # (3,)
    xc2c = xc2 - mu[:, None]
    # Centered covariance over all M padded pixels: each padded (zero) pixel
    # has centered value -mu, contributing (M - n_real) * mu mu^T.
    cov = (xc2c @ xc2c.T + (M - n_real) * jnp.outer(mu, mu)) / M   # (3, 3)
    Wm = w1.reshape(8, C)                                    # (8, 3)
    mean_v = Wm @ mu + b1                                    # (8,)
    var_v = jnp.maximum(jnp.einsum("oc,cd,od->o", Wm, cov, Wm), 0.0)
    scale = gamma2 * jax.lax.rsqrt(var_v + EPS)
    shift = beta2 - mean_v * scale
    params = jnp.concatenate(
        [Wm, b1[:, None], scale[:, None], shift[:, None]], axis=1
    ).reshape(-1)                                            # (48,) f32

    # ---- Fused convs + elementwise epilogue, tiled over M -------------------
    out3 = pl.pallas_call(
        _fused_kernel,
        out_shape=jax.ShapeDtypeStruct((8, r_pad, _LANES), jnp.float32),
        grid_spec=pltpu.PrefetchScalarGridSpec(
            num_scalar_prefetch=1,
            grid=(n_tiles,),
            in_specs=[pl.BlockSpec((2 * C, rt, _LANES), lambda i, p: (0, i, 0))],
            out_specs=pl.BlockSpec((8, rt, _LANES), lambda i, p: (0, i, 0)),
        ),
        compiler_params=pltpu.CompilerParams(
            dimension_semantics=("parallel",),
            vmem_limit_bytes=32 * 1024 * 1024,
        ),
    )(params, x12)

    # back to NCHW (reshape + one transpose, fused under jit)
    out = out3.reshape(8, r_pad * _LANES)[:, :M].reshape(8, N, Hp, Wp)
    return jnp.transpose(out, (1, 0, 2, 3))


def reference_forward(x1, x2, w1, b1, gamma2, beta2):
    """Pure-JAX reference of the PyTorch forward (for a sanity check)."""
    def conv1x1_pad1(x):
        xp = jnp.pad(x, ((0, 0), (0, 0), (1, 1), (1, 1)))
        return jnp.einsum("nchw,oc->nohw", xp, w1.reshape(8, 3)) \
            + b1[None, :, None, None]

    v1 = conv1x1_pad1(x1)
    v3 = conv1x1_pad1(x2)
    v4 = jnp.maximum(v3, 0.0)
    mean = jnp.mean(v3, axis=(0, 2, 3), keepdims=True)
    var = jnp.mean((v3 - mean) ** 2, axis=(0, 2, 3), keepdims=True)
    v7 = (v3 - mean) / jnp.sqrt(var + EPS) * gamma2[None, :, None, None] \
        + beta2[None, :, None, None]
    return v4 ** 3 + v3 - v1 * v7


if __name__ == "__main__":
    key = jax.random.PRNGKey(0)
    k1, k2, k3, k4 = jax.random.split(key, 4)

    N, C, H, W = 2, 3, 16, 16
    x1 = jax.random.normal(k1, (N, C, H, W), dtype=jnp.float32)
    x2 = jax.random.normal(k2, (N, C, H, W), dtype=jnp.float32)

    # Deterministic parameter init (conv1 kaiming-uniform-like, bn2 defaults).
    fan_in = C * 1 * 1
    bound = 1.0 / jnp.sqrt(jnp.float32(fan_in))
    w1 = jax.random.uniform(k3, (8, C, 1, 1), minval=-bound, maxval=bound,
                            dtype=jnp.float32)
    b1 = jax.random.uniform(k4, (8,), minval=-bound, maxval=bound,
                            dtype=jnp.float32)
    gamma2 = jnp.ones((8,), dtype=jnp.float32)   # bn2.weight default
    beta2 = jnp.zeros((8,), dtype=jnp.float32)   # bn2.bias default
    # NOTE: conv2 (v2) and bn1 (v5) are dead code w.r.t. the returned value.

    out = jax.block_until_ready(model_forward(x1, x2, w1, b1, gamma2, beta2))
    ref = jax.block_until_ready(reference_forward(x1, x2, w1, b1, gamma2, beta2))

    assert out.shape == (N, 8, H + 2, W + 2), out.shape
    if not jnp.allclose(out, ref, atol=2e-4, rtol=2e-4):
        raise AssertionError("Pallas kernel mismatch vs JAX reference")
    print("KERNEL_OK")
</pallas_src>

<mosaic_0001>
module attributes {stable_mosaic.version = 11 : i64} {
  func.func @_fused_kernel(%arg0: i32, %arg1: memref<48xf32, #tpu.memory_space<smem>>, %arg2: memref<6x32x128xf32, #tpu.memory_space<vmem>>, %arg3: memref<8x32x128xf32, #tpu.memory_space<vmem>>) attributes {dimension_semantics = [#tpu.dimension_semantics<parallel>], iteration_bounds = array<i64: 1>, scalar_prefetch = 1 : i64, scratch_operands = 0 : i64, tpu.core_type = #tpu.core_type<tc>, window_params = [{transform_indices = @transform_0, window_bounds = array<i64: 6, 32, 128>}, {transform_indices = @transform_1, window_bounds = array<i64: 8, 32, 128>}]} {
    %c0 = arith.constant 0 : index
    %0 = memref.load %arg1[%c0] : memref<48xf32, #tpu.memory_space<smem>>
    %c1 = arith.constant 1 : index
    %1 = memref.load %arg1[%c1] : memref<48xf32, #tpu.memory_space<smem>>
    %c2 = arith.constant 2 : index
    %2 = memref.load %arg1[%c2] : memref<48xf32, #tpu.memory_space<smem>>
    %c6 = arith.constant 6 : index
    %3 = memref.load %arg1[%c6] : memref<48xf32, #tpu.memory_space<smem>>
    %c7 = arith.constant 7 : index
    %4 = memref.load %arg1[%c7] : memref<48xf32, #tpu.memory_space<smem>>
    %c8 = arith.constant 8 : index
    %5 = memref.load %arg1[%c8] : memref<48xf32, #tpu.memory_space<smem>>
    %c12 = arith.constant 12 : index
    %6 = memref.load %arg1[%c12] : memref<48xf32, #tpu.memory_space<smem>>
    %c13 = arith.constant 13 : index
    %7 = memref.load %arg1[%c13] : memref<48xf32, #tpu.memory_space<smem>>
    %c14 = arith.constant 14 : index
    %8 = memref.load %arg1[%c14] : memref<48xf32, #tpu.memory_space<smem>>
    %c18 = arith.constant 18 : index
    %9 = memref.load %arg1[%c18] : memref<48xf32, #tpu.memory_space<smem>>
    %c19 = arith.constant 19 : index
    %10 = memref.load %arg1[%c19] : memref<48xf32, #tpu.memory_space<smem>>
    %c20 = arith.constant 20 : index
    %11 = memref.load %arg1[%c20] : memref<48xf32, #tpu.memory_space<smem>>
    %c24 = arith.constant 24 : index
    %12 = memref.load %arg1[%c24] : memref<48xf32, #tpu.memory_space<smem>>
    %c25 = arith.constant 25 : index
    %13 = memref.load %arg1[%c25] : memref<48xf32, #tpu.memory_space<smem>>
    %c26 = arith.constant 26 : index
    %14 = memref.load %arg1[%c26] : memref<48xf32, #tpu.memory_space<smem>>
    %c30 = arith.constant 30 : index
    %15 = memref.load %arg1[%c30] : memref<48xf32, #tpu.memory_space<smem>>
    %c31 = arith.constant 31 : index
    %16 = memref.load %arg1[%c31] : memref<48xf32, #tpu.memory_space<smem>>
    %c32 = arith.constant 32 : index
    %17 = memref.load %arg1[%c32] : memref<48xf32, #tpu.memory_space<smem>>
    %c36 = arith.constant 36 : index
    %18 = memref.load %arg1[%c36] : memref<48xf32, #tpu.memory_space<smem>>
    %c37 = arith.constant 37 : index
    %19 = memref.load %arg1[%c37] : memref<48xf32, #tpu.memory_space<smem>>
    %c38 = arith.constant 38 : index
    %20 = memref.load %arg1[%c38] : memref<48xf32, #tpu.memory_space<smem>>
    %c42 = arith.constant 42 : index
    %21 = memref.load %arg1[%c42] : memref<48xf32, #tpu.memory_space<smem>>
    %c43 = arith.constant 43 : index
    %22 = memref.load %arg1[%c43] : memref<48xf32, #tpu.memory_space<smem>>
    %c44 = arith.constant 44 : index
    %23 = memref.load %arg1[%c44] : memref<48xf32, #tpu.memory_space<smem>>
    %c3 = arith.constant 3 : index
    %24 = memref.load %arg1[%c3] : memref<48xf32, #tpu.memory_space<smem>>
    %c9 = arith.constant 9 : index
    %25 = memref.load %arg1[%c9] : memref<48xf32, #tpu.memory_space<smem>>
    %c15 = arith.constant 15 : index
    %26 = memref.load %arg1[%c15] : memref<48xf32, #tpu.memory_space<smem>>
    %c21 = arith.constant 21 : index
    %27 = memref.load %arg1[%c21] : memref<48xf32, #tpu.memory_space<smem>>
    %c27 = arith.constant 27 : index
    %28 = memref.load %arg1[%c27] : memref<48xf32, #tpu.memory_space<smem>>
    %c33 = arith.constant 33 : index
    %29 = memref.load %arg1[%c33] : memref<48xf32, #tpu.memory_space<smem>>
    %c39 = arith.constant 39 : index
    %30 = memref.load %arg1[%c39] : memref<48xf32, #tpu.memory_space<smem>>
    %c45 = arith.constant 45 : index
    %31 = memref.load %arg1[%c45] : memref<48xf32, #tpu.memory_space<smem>>
    %c4 = arith.constant 4 : index
    %32 = memref.load %arg1[%c4] : memref<48xf32, #tpu.memory_space<smem>>
    %c10 = arith.constant 10 : index
    %33 = memref.load %arg1[%c10] : memref<48xf32, #tpu.memory_space<smem>>
    %c16 = arith.constant 16 : index
    %34 = memref.load %arg1[%c16] : memref<48xf32, #tpu.memory_space<smem>>
    %c22 = arith.constant 22 : index
    %35 = memref.load %arg1[%c22] : memref<48xf32, #tpu.memory_space<smem>>
    %c28 = arith.constant 28 : index
    %36 = memref.load %arg1[%c28] : memref<48xf32, #tpu.memory_space<smem>>
    %c34 = arith.constant 34 : index
    %37 = memref.load %arg1[%c34] : memref<48xf32, #tpu.memory_space<smem>>
    %c40 = arith.constant 40 : index
    %38 = memref.load %arg1[%c40] : memref<48xf32, #tpu.memory_space<smem>>
    %c46 = arith.constant 46 : index
    %39 = memref.load %arg1[%c46] : memref<48xf32, #tpu.memory_space<smem>>
    %c5 = arith.constant 5 : index
    %40 = memref.load %arg1[%c5] : memref<48xf32, #tpu.memory_space<smem>>
    %c11 = arith.constant 11 : index
    %41 = memref.load %arg1[%c11] : memref<48xf32, #tpu.memory_space<smem>>
    %c17 = arith.constant 17 : index
    %42 = memref.load %arg1[%c17] : memref<48xf32, #tpu.memory_space<smem>>
    %c23 = arith.constant 23 : index
    %43 = memref.load %arg1[%c23] : memref<48xf32, #tpu.memory_space<smem>>
    %c29 = arith.constant 29 : index
    %44 = memref.load %arg1[%c29] : memref<48xf32, #tpu.memory_space<smem>>
    %c35 = arith.constant 35 : index
    %45 = memref.load %arg1[%c35] : memref<48xf32, #tpu.memory_space<smem>>
    %c41 = arith.constant 41 : index
    %46 = memref.load %arg1[%c41] : memref<48xf32, #tpu.memory_space<smem>>
    %c47 = arith.constant 47 : index
    %47 = memref.load %arg1[%c47] : memref<48xf32, #tpu.memory_space<smem>>
    %c0_0 = arith.constant 0 : index
    %c0_1 = arith.constant 0 : index
    %c0_2 = arith.constant 0 : index
    %48 = vector.load %arg2[%c0_0, %c0_1, %c0_2] : memref<6x32x128xf32, #tpu.memory_space<vmem>>, vector<1x32x128xf32>
    %49 = vector.shape_cast %48 : vector<1x32x128xf32> to vector<32x128xf32>
    %c1_3 = arith.constant 1 : index
    %c0_4 = arith.constant 0 : index
    %c0_5 = arith.constant 0 : index
    %50 = vector.load %arg2[%c1_3, %c0_4, %c0_5] : memref<6x32x128xf32, #tpu.memory_space<vmem>>, vector<1x32x128xf32>
    %51 = vector.shape_cast %50 : vector<1x32x128xf32> to vector<32x128xf32>
    %c2_6 = arith.constant 2 : index
    %c0_7 = arith.constant 0 : index
    %c0_8 = arith.constant 0 : index
    %52 = vector.load %arg2[%c2_6, %c0_7, %c0_8] : memref<6x32x128xf32, #tpu.memory_space<vmem>>, vector<1x32x128xf32>
    %53 = vector.shape_cast %52 : vector<1x32x128xf32> to vector<32x128xf32>
    %c3_9 = arith.constant 3 : index
    %c0_10 = arith.constant 0 : index
    %c0_11 = arith.constant 0 : index
    %54 = vector.load %arg2[%c3_9, %c0_10, %c0_11] : memref<6x32x128xf32, #tpu.memory_space<vmem>>, vector<1x32x128xf32>
    %55 = vector.shape_cast %54 : vector<1x32x128xf32> to vector<32x128xf32>
    %c4_12 = arith.constant 4 : index
    %c0_13 = arith.constant 0 : index
    %c0_14 = arith.constant 0 : index
    %56 = vector.load %arg2[%c4_12, %c0_13, %c0_14] : memref<6x32x128xf32, #tpu.memory_space<vmem>>, vector<1x32x128xf32>
    %57 = vector.shape_cast %56 : vector<1x32x128xf32> to vector<32x128xf32>
    %c5_15 = arith.constant 5 : index
    %c0_16 = arith.constant 0 : index
    %c0_17 = arith.constant 0 : index
    %58 = vector.load %arg2[%c5_15, %c0_16, %c0_17] : memref<6x32x128xf32, #tpu.memory_space<vmem>>, vector<1x32x128xf32>
    %59 = vector.shape_cast %58 : vector<1x32x128xf32> to vector<32x128xf32>
    %60 = vector.broadcast %0 : f32 to vector<32x128xf32>
    %61 = arith.mulf %60, %49 : vector<32x128xf32>
    %62 = vector.broadcast %1 : f32 to vector<32x128xf32>
    %63 = arith.mulf %62, %51 : vector<32x128xf32>
    %64 = arith.addf %61, %63 : vector<32x128xf32>
    %65 = vector.broadcast %2 : f32 to vector<32x128xf32>
    %66 = arith.mulf %65, %53 : vector<32x128xf32>
    %67 = arith.addf %64, %66 : vector<32x128xf32>
    %68 = vector.broadcast %24 : f32 to vector<32x128xf32>
    %69 = arith.addf %67, %68 : vector<32x128xf32>
    %70 = vector.broadcast %0 : f32 to vector<32x128xf32>
    %71 = arith.mulf %70, %55 : vector<32x128xf32>
    %72 = vector.broadcast %1 : f32 to vector<32x128xf32>
    %73 = arith.mulf %72, %57 : vector<32x128xf32>
    %74 = arith.addf %71, %73 : vector<32x128xf32>
    %75 = vector.broadcast %2 : f32 to vector<32x128xf32>
    %76 = arith.mulf %75, %59 : vector<32x128xf32>
    %77 = arith.addf %74, %76 : vector<32x128xf32>
    %78 = vector.broadcast %24 : f32 to vector<32x128xf32>
    %79 = arith.addf %77, %78 : vector<32x128xf32>
    %80 = vector.broadcast %32 : f32 to vector<32x128xf32>
    %81 = arith.mulf %79, %80 : vector<32x128xf32>
    %82 = vector.broadcast %40 : f32 to vector<32x128xf32>
    %83 = arith.addf %81, %82 : vector<32x128xf32>
    %cst = arith.constant 0.000000e+00 : f32
    %84 = vector.broadcast %cst : f32 to vector<32x128xf32>
    %85 = arith.maximumf %79, %84 : vector<32x128xf32>
    %86 = arith.mulf %85, %85 : vector<32x128xf32>
    %87 = arith.mulf %86, %85 : vector<32x128xf32>
    %88 = arith.addf %87, %79 : vector<32x128xf32>
    %89 = arith.mulf %69, %83 : vector<32x128xf32>
    %90 = arith.subf %88, %89 : vector<32x128xf32>
    %c0_18 = arith.constant 0 : index
    %c0_19 = arith.constant 0 : index
    %c0_20 = arith.constant 0 : index
    %91 = vector.load %arg3[%c0_18, %c0_19, %c0_20] : memref<8x32x128xf32, #tpu.memory_space<vmem>>, vector<1x32x128xf32>
    %92 = vector.shape_cast %91 : vector<1x32x128xf32> to vector<32x128xf32>
    %93 = vector.shape_cast %90 : vector<32x128xf32> to vector<1x32x128xf32>
    tpu.vector_store %arg3[%c0_18, %c0_19, %c0_20], %93 {strides = array<i32>} : memref<8x32x128xf32, #tpu.memory_space<vmem>>, vector<1x32x128xf32>,
    %94 = vector.broadcast %3 : f32 to vector<32x128xf32>
    %95 = arith.mulf %94, %49 : vector<32x128xf32>
    %96 = vector.broadcast %4 : f32 to vector<32x128xf32>
    %97 = arith.mulf %96, %51 : vector<32x128xf32>
    %98 = arith.addf %95, %97 : vector<32x128xf32>
    %99 = vector.broadcast %5 : f32 to vector<32x128xf32>
    %100 = arith.mulf %99, %53 : vector<32x128xf32>
    %101 = arith.addf %98, %100 : vector<32x128xf32>
    %102 = vector.broadcast %25 : f32 to vector<32x128xf32>
    %103 = arith.addf %101, %102 : vector<32x128xf32>
    %104 = vector.broadcast %3 : f32 to vector<32x128xf32>
    %105 = arith.mulf %104, %55 : vector<32x128xf32>
    %106 = vector.broadcast %4 : f32 to vector<32x128xf32>
    %107 = arith.mulf %106, %57 : vector<32x128xf32>
    %108 = arith.addf %105, %107 : vector<32x128xf32>
    %109 = vector.broadcast %5 : f32 to vector<32x128xf32>
    %110 = arith.mulf %109, %59 : vector<32x128xf32>
    %111 = arith.addf %108, %110 : vector<32x128xf32>
    %112 = vector.broadcast %25 : f32 to vector<32x128xf32>
    %113 = arith.addf %111, %112 : vector<32x128xf32>
    %114 = vector.broadcast %33 : f32 to vector<32x128xf32>
    %115 = arith.mulf %113, %114 : vector<32x128xf32>
    %116 = vector.broadcast %41 : f32 to vector<32x128xf32>
    %117 = arith.addf %115, %116 : vector<32x128xf32>
    %cst_21 = arith.constant 0.000000e+00 : f32
    %118 = vector.broadcast %cst_21 : f32 to vector<32x128xf32>
    %119 = arith.maximumf %113, %118 : vector<32x128xf32>
    %120 = arith.mulf %119, %119 : vector<32x128xf32>
    %121 = arith.mulf %120, %119 : vector<32x128xf32>
    %122 = arith.addf %121, %113 : vector<32x128xf32>
    %123 = arith.mulf %103, %117 : vector<32x128xf32>
    %124 = arith.subf %122, %123 : vector<32x128xf32>
    %c1_22 = arith.constant 1 : index
    %c0_23 = arith.constant 0 : index
    %c0_24 = arith.constant 0 : index
    %125 = vector.load %arg3[%c1_22, %c0_23, %c0_24] : memref<8x32x128xf32, #tpu.memory_space<vmem>>, vector<1x32x128xf32>
    %126 = vector.shape_cast %125 : vector<1x32x128xf32> to vector<32x128xf32>
    %127 = vector.shape_cast %124 : vector<32x128xf32> to vector<1x32x128xf32>
    tpu.vector_store %arg3[%c1_22, %c0_23, %c0_24], %127 {strides = array<i32>} : memref<8x32x128xf32, #tpu.memory_space<vmem>>, vector<1x32x128xf32>,
    %128 = vector.broadcast %6 : f32 to vector<32x128xf32>
    %129 = arith.mulf %128, %49 : vector<32x128xf32>
    %130 = vector.broadcast %7 : f32 to vector<32x128xf32>
    %131 = arith.mulf %130, %51 : vector<32x128xf32>
    %132 = arith.addf %129, %131 : vector<32x128xf32>
    %133 = vector.broadcast %8 : f32 to vector<32x128xf32>
    %134 = arith.mulf %133, %53 : vector<32x128xf32>
    %135 = arith.addf %132, %134 : vector<32x128xf32>
    %136 = vector.broadcast %26 : f32 to vector<32x128xf32>
    %137 = arith.addf %135, %136 : vector<32x128xf32>
    %138 = vector.broadcast %6 : f32 to vector<32x128xf32>
    %139 = arith.mulf %138, %55 : vector<32x128xf32>
    %140 = vector.broadcast %7 : f32 to vector<32x128xf32>
    %141 = arith.mulf %140, %57 : vector<32x128xf32>
    %142 = arith.addf %139, %141 : vector<32x128xf32>
    %143 = vector.broadcast %8 : f32 to vector<32x128xf32>
    %144 = arith.mulf %143, %59 : vector<32x128xf32>
    %145 = arith.addf %142, %144 : vector<32x128xf32>
    %146 = vector.broadcast %26 : f32 to vector<32x128xf32>
    %147 = arith.addf %145, %146 : vector<32x128xf32>
    %148 = vector.broadcast %34 : f32 to vector<32x128xf32>
    %149 = arith.mulf %147, %148 : vector<32x128xf32>
    %150 = vector.broadcast %42 : f32 to vector<32x128xf32>
    %151 = arith.addf %149, %150 : vector<32x128xf32>
    %cst_25 = arith.constant 0.000000e+00 : f32
    %152 = vector.broadcast %cst_25 : f32 to vector<32x128xf32>
    %153 = arith.maximumf %147, %152 : vector<32x128xf32>
    %154 = arith.mulf %153, %153 : vector<32x128xf32>
    %155 = arith.mulf %154, %153 : vector<32x128xf32>
    %156 = arith.addf %155, %147 : vector<32x128xf32>
    %157 = arith.mulf %137, %151 : vector<32x128xf32>
    %158 = arith.subf %156, %157 : vector<32x128xf32>
    %c2_26 = arith.constant 2 : index
    %c0_27 = arith.constant 0 : index
    %c0_28 = arith.constant 0 : index
    %159 = vector.load %arg3[%c2_26, %c0_27, %c0_28] : memref<8x32x128xf32, #tpu.memory_space<vmem>>, vector<1x32x128xf32>
    %160 = vector.shape_cast %159 : vector<1x32x128xf32> to vector<32x128xf32>
    %161 = vector.shape_cast %158 : vector<32x128xf32> to vector<1x32x128xf32>
    tpu.vector_store %arg3[%c2_26, %c0_27, %c0_28], %161 {strides = array<i32>} : memref<8x32x128xf32, #tpu.memory_space<vmem>>, vector<1x32x128xf32>,
    %162 = vector.broadcast %9 : f32 to vector<32x128xf32>
    %163 = arith.mulf %162, %49 : vector<32x128xf32>
    %164 = vector.broadcast %10 : f32 to vector<32x128xf32>
    %165 = arith.mulf %164, %51 : vector<32x128xf32>
    %166 = arith.addf %163, %165 : vector<32x128xf32>
    %167 = vector.broadcast %11 : f32 to vector<32x128xf32>
    %168 = arith.mulf %167, %53 : vector<32x128xf32>
    %169 = arith.addf %166, %168 : vector<32x128xf32>
    %170 = vector.broadcast %27 : f32 to vector<32x128xf32>
    %171 = arith.addf %169, %170 : vector<32x128xf32>
    %172 = vector.broadcast %9 : f32 to vector<32x128xf32>
    %173 = arith.mulf %172, %55 : vector<32x128xf32>
    %174 = vector.broadcast %10 : f32 to vector<32x128xf32>
    %175 = arith.mulf %174, %57 : vector<32x128xf32>
    %176 = arith.addf %173, %175 : vector<32x128xf32>
    %177 = vector.broadcast %11 : f32 to vector<32x128xf32>
    %178 = arith.mulf %177, %59 : vector<32x128xf32>
    %179 = arith.addf %176, %178 : vector<32x128xf32>
    %180 = vector.broadcast %27 : f32 to vector<32x128xf32>
    %181 = arith.addf %179, %180 : vector<32x128xf32>
    %182 = vector.broadcast %35 : f32 to vector<32x128xf32>
    %183 = arith.mulf %181, %182 : vector<32x128xf32>
    %184 = vector.broadcast %43 : f32 to vector<32x128xf32>
    %185 = arith.addf %183, %184 : vector<32x128xf32>
    %cst_29 = arith.constant 0.000000e+00 : f32
    %186 = vector.broadcast %cst_29 : f32 to vector<32x128xf32>
    %187 = arith.maximumf %181, %186 : vector<32x128xf32>
    %188 = arith.mulf %187, %187 : vector<32x128xf32>
    %189 = arith.mulf %188, %187 : vector<32x128xf32>
    %190 = arith.addf %189, %181 : vector<32x128xf32>
    %191 = arith.mulf %171, %185 : vector<32x128xf32>
    %192 = arith.subf %190, %191 : vector<32x128xf32>
    %c3_30 = arith.constant 3 : index
    %c0_31 = arith.constant 0 : index
    %c0_32 = arith.constant 0 : index
    %193 = vector.load %arg3[%c3_30, %c0_31, %c0_32] : memref<8x32x128xf32, #tpu.memory_space<vmem>>, vector<1x32x128xf32>
    %194 = vector.shape_cast %193 : vector<1x32x128xf32> to vector<32x128xf32>
    %195 = vector.shape_cast %192 : vector<32x128xf32> to vector<1x32x128xf32>
    tpu.vector_store %arg3[%c3_30, %c0_31, %c0_32], %195 {strides = array<i32>} : memref<8x32x128xf32, #tpu.memory_space<vmem>>, vector<1x32x128xf32>,
    %196 = vector.broadcast %12 : f32 to vector<32x128xf32>
    %197 = arith.mulf %196, %49 : vector<32x128xf32>
    %198 = vector.broadcast %13 : f32 to vector<32x128xf32>
    %199 = arith.mulf %198, %51 : vector<32x128xf32>
    %200 = arith.addf %197, %199 : vector<32x128xf32>
    %201 = vector.broadcast %14 : f32 to vector<32x128xf32>
    %202 = arith.mulf %201, %53 : vector<32x128xf32>
    %203 = arith.addf %200, %202 : vector<32x128xf32>
    %204 = vector.broadcast %28 : f32 to vector<32x128xf32>
    %205 = arith.addf %203, %204 : vector<32x128xf32>
    %206 = vector.broadcast %12 : f32 to vector<32x128xf32>
    %207 = arith.mulf %206, %55 : vector<32x128xf32>
    %208 = vector.broadcast %13 : f32 to vector<32x128xf32>
    %209 = arith.mulf %208, %57 : vector<32x128xf32>
    %210 = arith.addf %207, %209 : vector<32x128xf32>
    %211 = vector.broadcast %14 : f32 to vector<32x128xf32>
    %212 = arith.mulf %211, %59 : vector<32x128xf32>
    %213 = arith.addf %210, %212 : vector<32x128xf32>
    %214 = vector.broadcast %28 : f32 to vector<32x128xf32>
    %215 = arith.addf %213, %214 : vector<32x128xf32>
    %216 = vector.broadcast %36 : f32 to vector<32x128xf32>
    %217 = arith.mulf %215, %216 : vector<32x128xf32>
    %218 = vector.broadcast %44 : f32 to vector<32x128xf32>
    %219 = arith.addf %217, %218 : vector<32x128xf32>
    %cst_33 = arith.constant 0.000000e+00 : f32
    %220 = vector.broadcast %cst_33 : f32 to vector<32x128xf32>
    %221 = arith.maximumf %215, %220 : vector<32x128xf32>
    %222 = arith.mulf %221, %221 : vector<32x128xf32>
    %223 = arith.mulf %222, %221 : vector<32x128xf32>
    %224 = arith.addf %223, %215 : vector<32x128xf32>
    %225 = arith.mulf %205, %219 : vector<32x128xf32>
    %226 = arith.subf %224, %225 : vector<32x128xf32>
    %c4_34 = arith.constant 4 : index
    %c0_35 = arith.constant 0 : index
    %c0_36 = arith.constant 0 : index
    %227 = vector.load %arg3[%c4_34, %c0_35, %c0_36] : memref<8x32x128xf32, #tpu.memory_space<vmem>>, vector<1x32x128xf32>
    %228 = vector.shape_cast %227 : vector<1x32x128xf32> to vector<32x128xf32>
    %229 = vector.shape_cast %226 : vector<32x128xf32> to vector<1x32x128xf32>
    tpu.vector_store %arg3[%c4_34, %c0_35, %c0_36], %229 {strides = array<i32>} : memref<8x32x128xf32, #tpu.memory_space<vmem>>, vector<1x32x128xf32>,
    %230 = vector.broadcast %15 : f32 to vector<32x128xf32>
    %231 = arith.mulf %230, %49 : vector<32x128xf32>
    %232 = vector.broadcast %16 : f32 to vector<32x128xf32>
    %233 = arith.mulf %232, %51 : vector<32x128xf32>
    %234 = arith.addf %231, %233 : vector<32x128xf32>
    %235 = vector.broadcast %17 : f32 to vector<32x128xf32>
    %236 = arith.mulf %235, %53 : vector<32x128xf32>
    %237 = arith.addf %234, %236 : vector<32x128xf32>
    %238 = vector.broadcast %29 : f32 to vector<32x128xf32>
    %239 = arith.addf %237, %238 : vector<32x128xf32>
    %240 = vector.broadcast %15 : f32 to vector<32x128xf32>
    %241 = arith.mulf %240, %55 : vector<32x128xf32>
    %242 = vector.broadcast %16 : f32 to vector<32x128xf32>
    %243 = arith.mulf %242, %57 : vector<32x128xf32>
    %244 = arith.addf %241, %243 : vector<32x128xf32>
    %245 = vector.broadcast %17 : f32 to vector<32x128xf32>
    %246 = arith.mulf %245, %59 : vector<32x128xf32>
    %247 = arith.addf %244, %246 : vector<32x128xf32>
    %248 = vector.broadcast %29 : f32 to vector<32x128xf32>
    %249 = arith.addf %247, %248 : vector<32x128xf32>
    %250 = vector.broadcast %37 : f32 to vector<32x128xf32>
    %251 = arith.mulf %249, %250 : vector<32x128xf32>
    %252 = vector.broadcast %45 : f32 to vector<32x128xf32>
    %253 = arith.addf %251, %252 : vector<32x128xf32>
    %cst_37 = arith.constant 0.000000e+00 : f32
    %254 = vector.broadcast %cst_37 : f32 to vector<32x128xf32>
    %255 = arith.maximumf %249, %254 : vector<32x128xf32>
    %256 = arith.mulf %255, %255 : vector<32x128xf32>
    %257 = arith.mulf %256, %255 : vector<32x128xf32>
    %258 = arith.addf %257, %249 : vector<32x128xf32>
    %259 = arith.mulf %239, %253 : vector<32x128xf32>
    %260 = arith.subf %258, %259 : vector<32x128xf32>
    %c5_38 = arith.constant 5 : index
    %c0_39 = arith.constant 0 : index
    %c0_40 = arith.constant 0 : index
    %261 = vector.load %arg3[%c5_38, %c0_39, %c0_40] : memref<8x32x128xf32, #tpu.memory_space<vmem>>, vector<1x32x128xf32>
    %262 = vector.shape_cast %261 : vector<1x32x128xf32> to vector<32x128xf32>
    %263 = vector.shape_cast %260 : vector<32x128xf32> to vector<1x32x128xf32>
    tpu.vector_store %arg3[%c5_38, %c0_39, %c0_40], %263 {strides = array<i32>} : memref<8x32x128xf32, #tpu.memory_space<vmem>>, vector<1x32x128xf32>,
    %264 = vector.broadcast %18 : f32 to vector<32x128xf32>
    %265 = arith.mulf %264, %49 : vector<32x128xf32>
    %266 = vector.broadcast %19 : f32 to vector<32x128xf32>
    %267 = arith.mulf %266, %51 : vector<32x128xf32>
    %268 = arith.addf %265, %267 : vector<32x128xf32>
    %269 = vector.broadcast %20 : f32 to vector<32x128xf32>
    %270 = arith.mulf %269, %53 : vector<32x128xf32>
    %271 = arith.addf %268, %270 : vector<32x128xf32>
    %272 = vector.broadcast %30 : f32 to vector<32x128xf32>
    %273 = arith.addf %271, %272 : vector<32x128xf32>
    %274 = vector.broadcast %18 : f32 to vector<32x128xf32>
    %275 = arith.mulf %274, %55 : vector<32x128xf32>
    %276 = vector.broadcast %19 : f32 to vector<32x128xf32>
    %277 = arith.mulf %276, %57 : vector<32x128xf32>
    %278 = arith.addf %275, %277 : vector<32x128xf32>
    %279 = vector.broadcast %20 : f32 to vector<32x128xf32>
    %280 = arith.mulf %279, %59 : vector<32x128xf32>
    %281 = arith.addf %278, %280 : vector<32x128xf32>
    %282 = vector.broadcast %30 : f32 to vector<32x128xf32>
    %283 = arith.addf %281, %282 : vector<32x128xf32>
    %284 = vector.broadcast %38 : f32 to vector<32x128xf32>
    %285 = arith.mulf %283, %284 : vector<32x128xf32>
    %286 = vector.broadcast %46 : f32 to vector<32x128xf32>
    %287 = arith.addf %285, %286 : vector<32x128xf32>
    %cst_41 = arith.constant 0.000000e+00 : f32
    %288 = vector.broadcast %cst_41 : f32 to vector<32x128xf32>
    %289 = arith.maximumf %283, %288 : vector<32x128xf32>
    %290 = arith.mulf %289, %289 : vector<32x128xf32>
    %291 = arith.mulf %290, %289 : vector<32x128xf32>
    %292 = arith.addf %291, %283 : vector<32x128xf32>
    %293 = arith.mulf %273, %287 : vector<32x128xf32>
    %294 = arith.subf %292, %293 : vector<32x128xf32>
    %c6_42 = arith.constant 6 : index
    %c0_43 = arith.constant 0 : index
    %c0_44 = arith.constant 0 : index
    %295 = vector.load %arg3[%c6_42, %c0_43, %c0_44] : memref<8x32x128xf32, #tpu.memory_space<vmem>>, vector<1x32x128xf32>
    %296 = vector.shape_cast %295 : vector<1x32x128xf32> to vector<32x128xf32>
    %297 = vector.shape_cast %294 : vector<32x128xf32> to vector<1x32x128xf32>
    tpu.vector_store %arg3[%c6_42, %c0_43, %c0_44], %297 {strides = array<i32>} : memref<8x32x128xf32, #tpu.memory_space<vmem>>, vector<1x32x128xf32>,
    %298 = vector.broadcast %21 : f32 to vector<32x128xf32>
    %299 = arith.mulf %298, %49 : vector<32x128xf32>
    %300 = vector.broadcast %22 : f32 to vector<32x128xf32>
    %301 = arith.mulf %300, %51 : vector<32x128xf32>
    %302 = arith.addf %299, %301 : vector<32x128xf32>
    %303 = vector.broadcast %23 : f32 to vector<32x128xf32>
    %304 = arith.mulf %303, %53 : vector<32x128xf32>
    %305 = arith.addf %302, %304 : vector<32x128xf32>
    %306 = vector.broadcast %31 : f32 to vector<32x128xf32>
    %307 = arith.addf %305, %306 : vector<32x128xf32>
    %308 = vector.broadcast %21 : f32 to vector<32x128xf32>
    %309 = arith.mulf %308, %55 : vector<32x128xf32>
    %310 = vector.broadcast %22 : f32 to vector<32x128xf32>
    %311 = arith.mulf %310, %57 : vector<32x128xf32>
    %312 = arith.addf %309, %311 : vector<32x128xf32>
    %313 = vector.broadcast %23 : f32 to vector<32x128xf32>
    %314 = arith.mulf %313, %59 : vector<32x128xf32>
    %315 = arith.addf %312, %314 : vector<32x128xf32>
    %316 = vector.broadcast %31 : f32 to vector<32x128xf32>
    %317 = arith.addf %315, %316 : vector<32x128xf32>
    %318 = vector.broadcast %39 : f32 to vector<32x128xf32>
    %319 = arith.mulf %317, %318 : vector<32x128xf32>
    %320 = vector.broadcast %47 : f32 to vector<32x128xf32>
    %321 = arith.addf %319, %320 : vector<32x128xf32>
    %cst_45 = arith.constant 0.000000e+00 : f32
    %322 = vector.broadcast %cst_45 : f32 to vector<32x128xf32>
    %323 = arith.maximumf %317, %322 : vector<32x128xf32>
    %324 = arith.mulf %323, %323 : vector<32x128xf32>
    %325 = arith.mulf %324, %323 : vector<32x128xf32>
    %326 = arith.addf %325, %317 : vector<32x128xf32>
    %327 = arith.mulf %307, %321 : vector<32x128xf32>
    %328 = arith.subf %326, %327 : vector<32x128xf32>
    %c7_46 = arith.constant 7 : index
    %c0_47 = arith.constant 0 : index
    %c0_48 = arith.constant 0 : index
    %329 = vector.load %arg3[%c7_46, %c0_47, %c0_48] : memref<8x32x128xf32, #tpu.memory_space<vmem>>, vector<1x32x128xf32>
    %330 = vector.shape_cast %329 : vector<1x32x128xf32> to vector<32x128xf32>
    %331 = vector.shape_cast %328 : vector<32x128xf32> to vector<1x32x128xf32>
    tpu.vector_store %arg3[%c7_46, %c0_47, %c0_48], %331 {strides = array<i32>} : memref<8x32x128xf32, #tpu.memory_space<vmem>>, vector<1x32x128xf32>,
    return
  }
  func.func @transform_0(%arg0: i32, %arg1: memref<48xf32, #tpu.memory_space<smem>>) -> (i32, i32, i32) {
    %c0_i32 = arith.constant 0 : i32
    %c0_i32_0 = arith.constant 0 : i32
    %c0_i32_1 = arith.constant 0 : i32
    return %c0_i32, %arg0, %c0_i32_0 : i32, i32, i32
  }
  func.func @transform_1(%arg0: i32, %arg1: memref<48xf32, #tpu.memory_space<smem>>) -> (i32, i32, i32) {
    %c0_i32 = arith.constant 0 : i32
    %c0_i32_0 = arith.constant 0 : i32
    %c0_i32_1 = arith.constant 0 : i32
    return %c0_i32, %arg0, %c0_i32_0 : i32, i32, i32
  }
}

</mosaic_0001>

<bundles_post_ra>
// kernel: model_forward.1
= control target key start
LH: loop header
LB: loop body
LE: loop exit
PB: predicated region body
PF: predicated region fallthrough
CT: control target
= control target key end

     0   :  { %s2046_s0 = inlined_call_operand.vmem [shape: f32[48], index: 0, kind: input, shape index: {}]   ;;  %s2047_s1 = inlined_call_operand.vmem [shape: f32[6,32,128], index: 1, kind: input, shape index: {}]   ;;  %s2048_s2 = inlined_call_operand.vmem [shape: f32[8,32,128], index: 2, kind: output, shape index: {}]  }
   0x1   :  { %s7_s11 = sshll.u32 %s2046_s0, 4  ;;  %s8_s11 = int_to_ptr.vmem [resolvable:$true] %s7_s11 }
   0x2   :  { %s943_s12 = scalar_lea.vmem %s8_s11, 16  ;;  %p948_p1 = scmp.lt.s32.totalorder %s8_s11, %s8_s11 }
   0x3   :  { %p944_p0 = scmp.ne.s32.totalorder %s8_s11, %s943_s12  ;;  %p949_p2 = scmp.lt.s32.totalorder %s943_s12, %s943_s12 }
   0x5   :  { %p950_p3 = por %p949_p2, %p948_p1 }
   0x7   :  { %p951_p4 = pnand %p950_p3, %p944_p0 }
   0x9   :  { %954 = shalt.err (!%p951_p4)  }
   0xa   :  { %s957_s13 = smov [#allocation3]  }
   0xb   :  { %10 = dma.vmem_to_smem %s8_s11, 16, %s957_s13, [#allocation2] }
   0xc   :  { %955 = dma.done.wait [#allocation2], 16 }
   0xd   :  { %956 = vsyncadd [#allocation2], 4294967280 }
   0xe   :  { %12 = sfence }
   0xf   :  { %s15_s14 = sld [smem:[#allocation3]]  ;;  %s823_s15 = sld [smem:[#allocation3 + $0x1]]  ;;  %v979_v0 = vld [vmem:[%s2047_s1] sm:$0xff]  ;;  %v1013_v8 = vld [vmem:[%s2047_s1 + $0x8] sm:$0xff]  ;;  %v1059_v22 = vld [vmem:[%s2047_s1 + $0x10] sm:$0xff] }
  0x10   :  { %s824_s16 = sld [smem:[#allocation3 + $0x2]]  ;;  %s846_s17 = sld [smem:[#allocation3 + $0x3]]  ;;  %v984_v1 = vld [vmem:[%s2047_s1 + $0x20] sm:$0xff]  ;;  %v1018_v9 = vld [vmem:[%s2047_s1 + $0x28] sm:$0xff]  ;;  %v1070_v27 = vld [vmem:[%s2047_s1 + $0x30] sm:$0xff] }
  0x11   :  { %s854_s18 = sld [smem:[#allocation3 + $0x4]]  ;;  %s862_s19 = sld [smem:[#allocation3 + $0x5]]  ;;  %v989_v2 = vld [vmem:[%s2047_s1 + $0x40] sm:$0xff]  ;;  %v1031_v14 = vld [vmem:[%s2047_s1 + $0x48] sm:$0xff]  ;;  %v1075_v28 = vld [vmem:[%s2047_s1 + $0x50] sm:$0xff] }
  0x12   :  { %v994_v3 = vld [vmem:[%s2047_s1 + $0x60] sm:$0xff]  ;;  %v1036_v15 = vld [vmem:[%s2047_s1 + $0x68] sm:$0xff]  ;;  %v1086_v33 = vld [vmem:[%s2047_s1 + $0x70] sm:$0xff]  ;;  %s1131_s4 = sld [smem:[#allocation3 + $0x6]]  ;;  %s1144_s7 = sld [smem:[#allocation3 + $0x7]] }
  0x13   :  { %v999_v4 = vld [vmem:[%s2047_s1 + $0x80] sm:$0xff]  ;;  %v1049_v20 = vld [vmem:[%s2047_s1 + $0x88] sm:$0xff]  ;;  %v1091_v34 = vld [vmem:[%s2047_s1 + $0x90] sm:$0xff]  ;;  %s1163_s12 = sld [smem:[#allocation3 + $0x8]]  ;;  %s1165_s13 = sld [smem:[#allocation3 + $0x9]] }
  0x14   :  { %v1004_v5 = vld [vmem:[%s2047_s1 + $0xa0] sm:$0xff]  ;;  %v1054_v21 = vld [vmem:[%s2047_s1 + $0xa8] sm:$0xff]  ;;  %v1100_v38 = vld [vmem:[%s2047_s1 + $0xb0] sm:$0xff]  ;;  %s1260_s24 = sld [smem:[#allocation3 + $0xd]]  ;;  %s1262_s25 = sld [smem:[#allocation3 + $0xe]] }
  0x15   :  { %v1006_v6 = vstv %s15_s14  ;;  %v1008_v7 = vstv %s823_s15  ;;  %v1111_v44 = vld [vmem:[%s2047_s1 + $0x18] sm:$0xff]  ;;  %s1175_s14 = sld [smem:[#allocation3 + $0xa]]  ;;  %s1177_s15 = sld [smem:[#allocation3 + $0xb]] }
  0x16   :  { %v93_v10 = vmul.f32 %v1006_v6, %v979_v0  ;;  %v98_v11 = vmul.f32 %v984_v1, %v1008_v7  ;;  %v1024_v12 = vstv %s824_s16  ;;  %v1026_v13 = vstv %s846_s17  ;;  %v1116_v45 = vld [vmem:[%s2047_s1 + $0x38] sm:$0xff]  ;;  %s1270_s26 = sld [smem:[#allocation3 + $0xf]]  ;;  %s1280_s27 = sld [smem:[#allocation3 + $0x10]] }
  0x17   :  { %v107_v16 = vmul.f32 %v989_v2, %v1024_v12  ;;  %v120_v17 = vmul.f32 %v994_v3, %v1006_v6  ;;  %v124_v18 = vmul.f32 %v999_v4, %v1008_v7  ;;  %v132_v19 = vmul.f32 %v1004_v5, %v1024_v12  ;;  %v1129_v54 = vld [vmem:[%s2047_s1 + $0x58] sm:$0xff]  ;;  %s1282_s28 = sld [smem:[#allocation3 + $0x11]]  ;;  %s1366_s10 = sld [smem:[#allocation3 + $0x13]] }
  0x18   :  { %v102_v23 = vadd.f32 %v98_v11, %v93_v10  ;;  %v1061_v24 = vstv %s854_s18  ;;  %v1063_v25 = vstv %s862_s19  ;;  %v94_v26 = vmul.f32 %v1006_v6, %v1013_v8  ;;  %v1136_v57 = vld [vmem:[%s2047_s1 + $0x78] sm:$0xff]  ;;  %s1248_s19 = sld [smem:[#allocation3 + $0xc]]  ;;  %s1458_s18 = sld [smem:[#allocation3 + $0x18]] }
  0x19   :  { %v128_v29 = vadd.f32 %v124_v18, %v120_v17  ;;  %v99_v30 = vmul.f32 %v1018_v9, %v1008_v7  ;;  %v108_v31 = vmul.f32 %v1031_v14, %v1024_v12  ;;  %v121_v32 = vmul.f32 %v1036_v15, %v1006_v6  ;;  %v1155_v17 = vld [vmem:[%s2047_s1 + $0xb8] sm:$0xff]  ;;  %s1372_s11 = sld [smem:[#allocation3 + $0x14]]  ;;  %s1559_s6 = sld [smem:[#allocation3 + $0x1e]] }
  0x1a   :  { %v111_v35 = vadd.f32 %v107_v16, %v102_v23  ;;  %v125_v36 = vmul.f32 %v1049_v20, %v1008_v7  ;;  %v133_v37 = vmul.f32 %v1054_v21, %v1024_v12  ;;  %v95_v39 = vmul.f32 %v1006_v6, %v1059_v22  ;;  %v1150_v16 = vld [vmem:[%s2047_s1 + $0x98] sm:$0xff]  ;;  %s1670_s21 = sld [smem:[#allocation3 + $0x24]]  ;;  %s1690_s23 = sld [smem:[#allocation3 + $0x26]] }
  0x1b   :  { %v136_v40 = vadd.f32 %v132_v19, %v128_v29  ;;  %v103_v41 = vadd.f32 %v99_v30, %v94_v26  ;;  %v100_v42 = vmul.f32 %v1070_v27, %v1008_v7  ;;  %v109_v43 = vmul.f32 %v1075_v28, %v1024_v12  ;;  %s1858_s9 = sld [smem:[#allocation3 + $0x2b]]  ;;  %s1886_s0 = sld [smem:[#allocation3 + $0x2c]] }
  0x1c   :  { %v116_v46 = vadd.f32 %v1026_v13, %v111_v35  ;;  %v129_v47 = vadd.f32 %v125_v36, %v121_v32  ;;  %v122_v48 = vmul.f32 %v1086_v33, %v1006_v6  ;;  %v126_v49 = vmul.f32 %v1091_v34, %v1008_v7  ;;  %s1933_s29 = sld [smem:[#allocation3 + $0x2e]]  ;;  %s1935_s30 = sld [smem:[#allocation3 + $0x2f]] }
  0x1d   :  { %v140_v50 = vadd.f32 %v136_v40, %v1026_v13  ;;  %v112_v51 = vadd.f32 %v108_v31, %v103_v41  ;;  %v104_v52 = vadd.f32 %v100_v42, %v95_v39  ;;  %v134_v53 = vmul.f32 %v1100_v38, %v1024_v12 }
  0x1e   :  { %v137_v55 = vadd.f32 %v133_v37, %v129_v47  ;;  %v130_v56 = vadd.f32 %v126_v49, %v122_v48  ;;  %v96_v58 = vmul.f32 %v1006_v6, %v1111_v44  ;;  %v101_v59 = vmul.f32 %v1116_v45, %v1008_v7 }
  0x1f   :  { %v145_v60 = vmul.f32 %v1061_v24, %v140_v50  ;;  %v154_v61 = vmax.f32 %v140_v50, 0.0  ;;  %v117_v62 = vadd.f32 %v1026_v13, %v112_v51  ;;  %v113_v63 = vadd.f32 %v109_v43, %v104_v52 }
  0x20   :  { %v141_v10 = vadd.f32 %v137_v55, %v1026_v13  ;;  %v138_v11 = vadd.f32 %v134_v53, %v130_v56  ;;  %v105_v18 = vadd.f32 %v101_v59, %v96_v58  ;;  %v110_v19 = vmul.f32 %v1129_v54, %v1024_v12 }
  0x21   :  { %v150_v23 = vadd.f32 %v1063_v25, %v145_v60  ;;  %v158_v26 = vmul.f32 %v154_v61, %v154_v61  ;;  %v118_v29 = vadd.f32 %v1026_v13, %v113_v63  ;;  %v123_v30 = vmul.f32 %v1136_v57, %v1006_v6 }
  0x22   :  { %v146_v31 = vmul.f32 %v1061_v24, %v141_v10  ;;  %v155_v32 = vmax.f32 %v141_v10, 0.0  ;;  %v142_v35 = vadd.f32 %v138_v11, %v1026_v13  ;;  %v114_v36 = vadd.f32 %v110_v19, %v105_v18 }
  0x23   :  { %v162_v37 = vmul.f32 %v158_v26, %v154_v61  ;;  %v170_v39 = vmul.f32 %v150_v23, %v116_v46  ;;  %v127_v40 = vmul.f32 %v1150_v16, %v1008_v7  ;;  %v135_v41 = vmul.f32 %v1155_v17, %v1024_v12 }
  0x24   :  { %v151_v6 = vadd.f32 %v1063_v25, %v146_v31  ;;  %v159_v42 = vmul.f32 %v155_v32, %v155_v32  ;;  %v147_v43 = vmul.f32 %v1061_v24, %v142_v35  ;;  %v156_v47 = vmax.f32 %v142_v35, 0.0 }
  0x25   :  { %v166_v48 = vadd.f32 %v162_v37, %v140_v50  ;;  %v119_v46 = vadd.f32 %v1026_v13, %v114_v36  ;;  %v131_v49 = vadd.f32 %v127_v40, %v123_v30  ;;  %v1181_v7 = vstv %s1131_s4  ;;  %s1841_s4 = sld [smem:[#allocation3 + $0x2a]] }
  0x26   :  { %v163_v12 = vmul.f32 %v159_v42, %v155_v32  ;;  %v171_v51 = vmul.f32 %v151_v6, %v117_v62  ;;  %v152_v52 = vadd.f32 %v1063_v25, %v147_v43  ;;  %v160_v53 = vmul.f32 %v156_v47, %v156_v47 }
  0x27   :  { %v174_v55 = vsub.f32 %v166_v48, %v170_v39  ;;  %v139_v56 = vadd.f32 %v135_v41, %v131_v49  ;;  %v183_v58 = vmul.f32 %v1181_v7, %v979_v0  ;;  %v1187_v59 = vstv %s1144_s7  ;;  %s1351_s7 = sld [smem:[#allocation3 + $0x12]] }
  0x28   :  { %v167_v50 = vadd.f32 %v163_v12, %v141_v10  ;;  %v164_v60 = vmul.f32 %v160_v53, %v156_v47  ;;  %v172_v61 = vmul.f32 %v152_v52, %v118_v29  ;;  %v188_v63 = vmul.f32 %v984_v1, %v1187_v59 }
  0x29   :  { %178 = vst [vmem:[%s2048_s2] sm:$0xff] %v174_v55  ;;  %v143_v62 = vadd.f32 %v139_v56, %v1026_v13  ;;  %v1196_v11 = vstv %s1163_s12  ;;  %v1199_v18 = vstv %s1165_s13  ;;  %v210_v10 = vmul.f32 %v994_v3, %v1181_v7  ;;  %s1374_s12 = sld [smem:[#allocation3 + $0x15]]  ;;  %s1386_s13 = sld [smem:[#allocation3 + $0x16]] }
  0x2a   :  { %v175_v19 = vsub.f32 %v167_v50, %v171_v51  ;;  %v168_v23 = vadd.f32 %v164_v60, %v142_v35  ;;  %v192_v26 = vadd.f32 %v188_v63, %v183_v58  ;;  %v197_v29 = vmul.f32 %v989_v2, %v1196_v11 }
  0x2b   :  { %v148_v30 = vmul.f32 %v1061_v24, %v143_v62  ;;  %v157_v31 = vmax.f32 %v143_v62, 0.0  ;;  %v214_v13 = vmul.f32 %v999_v4, %v1187_v59  ;;  %v222_v32 = vmul.f32 %v1004_v5, %v1196_v11 }
  0x2c   :  { %179 = vst [vmem:[%s2048_s2 + $0x8] sm:$0xff] %v175_v19  ;;  %v176_v36 = vsub.f32 %v168_v23, %v172_v61  ;;  %v201_v37 = vadd.f32 %v197_v29, %v192_v26  ;;  %v1214_v35 = vstv %s1175_s14  ;;  %v1217_v39 = vstv %s1177_s15  ;;  %s1388_s14 = sld [smem:[#allocation3 + $0x17]] }
  0x2d   :  { %v153_v40 = vadd.f32 %v1063_v25, %v148_v30  ;;  %v161_v24 = vmul.f32 %v157_v31, %v157_v31  ;;  %v218_v41 = vadd.f32 %v214_v13, %v210_v10  ;;  %v184_v6 = vmul.f32 %v1181_v7, %v1013_v8 }
  0x2e   :  { %180 = vst [vmem:[%s2048_s2 + $0x10] sm:$0xff] %v176_v36  ;;  %v206_v42 = vadd.f32 %v1199_v18, %v201_v37  ;;  %v189_v43 = vmul.f32 %v1018_v9, %v1187_v59  ;;  %v198_v47 = vmul.f32 %v1031_v14, %v1196_v11  ;;  %v211_v25 = vmul.f32 %v1036_v15, %v1181_v7 }
  0x2f   :  { %v165_v48 = vmul.f32 %v161_v24, %v157_v31  ;;  %v173_v49 = vmul.f32 %v153_v40, %v119_v46  ;;  %v226_v12 = vadd.f32 %v222_v32, %v218_v41  ;;  %v215_v51 = vmul.f32 %v1049_v20, %v1187_v59 }
  0x30   :  { %v193_v52 = vadd.f32 %v189_v43, %v184_v6  ;;  %v223_v53 = vmul.f32 %v1054_v21, %v1196_v11  ;;  %v185_v55 = vmul.f32 %v1181_v7, %v1059_v22  ;;  %v190_v56 = vmul.f32 %v1070_v27, %v1187_v59 }
  0x31   :  { %v169_v58 = vadd.f32 %v165_v48, %v143_v62  ;;  %v230_v50 = vadd.f32 %v226_v12, %v1199_v18  ;;  %v219_v60 = vadd.f32 %v215_v51, %v211_v25  ;;  %v199_v46 = vmul.f32 %v1075_v28, %v1196_v11 }
  0x32   :  { %v202_v61 = vadd.f32 %v198_v47, %v193_v52  ;;  %v194_v63 = vadd.f32 %v190_v56, %v185_v55  ;;  %v212_v10 = vmul.f32 %v1086_v33, %v1181_v7  ;;  %v216_v19 = vmul.f32 %v1091_v34, %v1187_v59 }
  0x33   :  { %v177_v23 = vsub.f32 %v169_v58, %v173_v49  ;;  %v235_v26 = vmul.f32 %v1214_v35, %v230_v50  ;;  %v244_v29 = vmax.f32 %v230_v50, 0.0  ;;  %v227_v30 = vadd.f32 %v223_v53, %v219_v60 }
  0x34   :  { %v207_v62 = vadd.f32 %v1199_v18, %v202_v61  ;;  %v203_v31 = vadd.f32 %v199_v46, %v194_v63  ;;  %v220_v13 = vadd.f32 %v216_v19, %v212_v10  ;;  %v224_v32 = vmul.f32 %v1100_v38, %v1196_v11 }
  0x35   :  { %181 = vst [vmem:[%s2048_s2 + $0x18] sm:$0xff] %v177_v23  ;;  %v240_v36 = vadd.f32 %v1217_v39, %v235_v26  ;;  %v248_v37 = vmul.f32 %v244_v29, %v244_v29  ;;  %v231_v40 = vadd.f32 %v227_v30, %v1199_v18  ;;  %v186_v24 = vmul.f32 %v1181_v7, %v1111_v44 }
  0x36   :  { %v208_v41 = vadd.f32 %v1199_v18, %v203_v31  ;;  %v228_v6 = vadd.f32 %v224_v32, %v220_v13  ;;  %v191_v43 = vmul.f32 %v1116_v45, %v1187_v59  ;;  %v200_v47 = vmul.f32 %v1129_v54, %v1196_v11 }
  0x37   :  { %v252_v25 = vmul.f32 %v248_v37, %v244_v29  ;;  %v260_v48 = vmul.f32 %v240_v36, %v206_v42  ;;  %v236_v49 = vmul.f32 %v1214_v35, %v231_v40  ;;  %v245_v12 = vmax.f32 %v231_v40, 0.0 }
  0x38   :  { %v232_v51 = vadd.f32 %v228_v6, %v1199_v18  ;;  %v195_v52 = vadd.f32 %v191_v43, %v186_v24  ;;  %v213_v53 = vmul.f32 %v1136_v57, %v1181_v7  ;;  %v217_v55 = vmul.f32 %v1150_v16, %v1187_v59 }
  0x39   :  { %v256_v56 = vadd.f32 %v252_v25, %v230_v50  ;;  %v241_v58 = vadd.f32 %v1217_v39, %v236_v49  ;;  %v249_v60 = vmul.f32 %v245_v12, %v245_v12  ;;  %v225_v42 = vmul.f32 %v1155_v17, %v1196_v11 }
  0x3a   :  { %v237_v46 = vmul.f32 %v1214_v35, %v232_v51  ;;  %v246_v61 = vmax.f32 %v232_v51, 0.0  ;;  %v204_v7 = vadd.f32 %v200_v47, %v195_v52  ;;  %v221_v63 = vadd.f32 %v217_v55, %v213_v53 }
  0x3b   :  { %v264_v10 = vsub.f32 %v256_v56, %v260_v48  ;;  %v253_v59 = vmul.f32 %v249_v60, %v245_v12  ;;  %v261_v50 = vmul.f32 %v241_v58, %v207_v62  ;;  %v1286_v19 = vstv %s1248_s19  ;;  %s1466_s19 = sld [smem:[#allocation3 + $0x19]] }
  0x3c   :  { %v242_v23 = vadd.f32 %v1217_v39, %v237_v46  ;;  %v250_v11 = vmul.f32 %v246_v61, %v246_v61  ;;  %v209_v26 = vadd.f32 %v1199_v18, %v204_v7  ;;  %v229_v29 = vadd.f32 %v225_v42, %v221_v63 }
  0x3d   :  { %890 = vst [vmem:[%s2048_s2 + $0x20] sm:$0xff] %v264_v10  ;;  %v257_v30 = vadd.f32 %v253_v59, %v231_v40  ;;  %v274_v31 = vmul.f32 %v1286_v19, %v979_v0  ;;  %v1296_v13 = vstv %s1260_s24  ;;  %v1299_v62 = vstv %s1262_s25  ;;  %s1478_s24 = sld [smem:[#allocation3 + $0x1a]]  ;;  %s1480_s25 = sld [smem:[#allocation3 + $0x1b]] }
  0x3e   :  { %v254_v32 = vmul.f32 %v250_v11, %v246_v61  ;;  %v262_v36 = vmul.f32 %v242_v23, %v208_v41  ;;  %v233_v37 = vadd.f32 %v229_v29, %v1199_v18  ;;  %v279_v24 = vmul.f32 %v984_v1, %v1296_v13 }
  0x3f   :  { %v265_v6 = vsub.f32 %v257_v30, %v261_v50  ;;  %v288_v40 = vmul.f32 %v989_v2, %v1299_v62  ;;  %v1307_v43 = vstv %s1270_s26  ;;  %v301_v47 = vmul.f32 %v994_v3, %v1286_v19  ;;  %s1492_s26 = sld [smem:[#allocation3 + $0x1c]] }
  0x40   :  { %v258_v25 = vadd.f32 %v254_v32, %v232_v51  ;;  %v238_v48 = vmul.f32 %v1214_v35, %v233_v37  ;;  %v247_v49 = vmax.f32 %v233_v37, 0.0  ;;  %v283_v12 = vadd.f32 %v279_v24, %v274_v31 }
  0x41   :  { %891 = vst [vmem:[%s2048_s2 + $0x28] sm:$0xff] %v265_v6  ;;  %v305_v18 = vmul.f32 %v999_v4, %v1296_v13  ;;  %v313_v41 = vmul.f32 %v1004_v5, %v1299_v62  ;;  %v1320_v52 = vstv %s1280_s27  ;;  %v1323_v53 = vstv %s1282_s28  ;;  %s1494_s27 = sld [smem:[#allocation3 + $0x1d]] }
  0x42   :  { %v266_v55 = vsub.f32 %v258_v25, %v262_v36  ;;  %v243_v51 = vadd.f32 %v1217_v39, %v238_v48  ;;  %v251_v35 = vmul.f32 %v247_v49, %v247_v49  ;;  %v292_v56 = vadd.f32 %v288_v40, %v283_v12 }
  0x43   :  { %v309_v58 = vadd.f32 %v305_v18, %v301_v47  ;;  %v275_v60 = vmul.f32 %v1286_v19, %v1013_v8  ;;  %v280_v42 = vmul.f32 %v1018_v9, %v1296_v13  ;;  %v289_v46 = vmul.f32 %v1031_v14, %v1299_v62 }
  0x44   :  { %892 = vst [vmem:[%s2048_s2 + $0x30] sm:$0xff] %v266_v55  ;;  %v255_v61 = vmul.f32 %v251_v35, %v247_v49  ;;  %v263_v7 = vmul.f32 %v243_v51, %v209_v26  ;;  %v297_v39 = vadd.f32 %v1307_v43, %v292_v56  ;;  %v302_v63 = vmul.f32 %v1036_v15, %v1286_v19 }
  0x45   :  { %v317_v10 = vadd.f32 %v313_v41, %v309_v58  ;;  %v284_v59 = vadd.f32 %v280_v42, %v275_v60  ;;  %v306_v50 = vmul.f32 %v1049_v20, %v1296_v13  ;;  %v314_v23 = vmul.f32 %v1054_v21, %v1299_v62 }
  0x46   :  { %v259_v11 = vadd.f32 %v255_v61, %v233_v37  ;;  %v276_v29 = vmul.f32 %v1286_v19, %v1059_v22  ;;  %v281_v26 = vmul.f32 %v1070_v27, %v1296_v13  ;;  %v290_v30 = vmul.f32 %v1075_v28, %v1299_v62 }
  0x47   :  { %v321_v31 = vadd.f32 %v317_v10, %v1307_v43  ;;  %v293_v32 = vadd.f32 %v289_v46, %v284_v59  ;;  %v310_v36 = vadd.f32 %v306_v50, %v302_v63  ;;  %v303_v24 = vmul.f32 %v1086_v33, %v1286_v19 }
  0x48   :  { %v267_v6 = vsub.f32 %v259_v11, %v263_v7  ;;  %v285_v37 = vadd.f32 %v281_v26, %v276_v29  ;;  %v307_v40 = vmul.f32 %v1091_v34, %v1296_v13  ;;  %v315_v47 = vmul.f32 %v1100_v38, %v1299_v62 }
  0x49   :  { %v326_v25 = vmul.f32 %v1320_v52, %v321_v31  ;;  %v335_v48 = vmax.f32 %v321_v31, 0.0  ;;  %v298_v49 = vadd.f32 %v1307_v43, %v293_v32  ;;  %v318_v12 = vadd.f32 %v314_v23, %v310_v36 }
  0x4a   :  { %893 = vst [vmem:[%s2048_s2 + $0x38] sm:$0xff] %v267_v6  ;;  %v294_v18 = vadd.f32 %v290_v30, %v285_v37  ;;  %v311_v41 = vadd.f32 %v307_v40, %v303_v24  ;;  %v277_v55 = vmul.f32 %v1286_v19, %v1111_v44  ;;  %v282_v51 = vmul.f32 %v1116_v45, %v1296_v13 }
  0x4b   :  { %v331_v35 = vadd.f32 %v1323_v53, %v326_v25  ;;  %v339_v56 = vmul.f32 %v335_v48, %v335_v48  ;;  %v322_v58 = vadd.f32 %v318_v12, %v1307_v43  ;;  %v291_v60 = vmul.f32 %v1129_v54, %v1299_v62 }
  0x4c   :  { %v299_v42 = vadd.f32 %v1307_v43, %v294_v18  ;;  %v319_v46 = vadd.f32 %v315_v47, %v311_v41  ;;  %v286_v61 = vadd.f32 %v282_v51, %v277_v55  ;;  %v304_v7 = vmul.f32 %v1136_v57, %v1286_v19 }
  0x4d   :  { %v343_v63 = vmul.f32 %v339_v56, %v335_v48  ;;  %v351_v10 = vmul.f32 %v331_v35, %v297_v39  ;;  %v327_v59 = vmul.f32 %v1320_v52, %v322_v58  ;;  %v336_v50 = vmax.f32 %v322_v58, 0.0 }
  0x4e   :  { %v323_v23 = vadd.f32 %v319_v46, %v1307_v43  ;;  %v295_v11 = vadd.f32 %v291_v60, %v286_v61  ;;  %v308_v29 = vmul.f32 %v1150_v16, %v1296_v13  ;;  %v316_v26 = vmul.f32 %v1155_v17, %v1299_v62 }
  0x4f   :  { %v347_v30 = vadd.f32 %v343_v63, %v321_v31  ;;  %v332_v32 = vadd.f32 %v1323_v53, %v327_v59  ;;  %v340_v36 = vmul.f32 %v336_v50, %v336_v50  ;;  %v1391_v19 = vstv %s1351_s7  ;;  %s1566_s7 = sld [smem:[#allocation3 + $0x1f]] }
  0x50   :  { %v328_v39 = vmul.f32 %v1320_v52, %v323_v23  ;;  %v337_v24 = vmax.f32 %v323_v23, 0.0  ;;  %v300_v13 = vadd.f32 %v1307_v43, %v295_v11  ;;  %v312_v6 = vadd.f32 %v308_v29, %v304_v7 }
  0x51   :  { %v355_v62 = vsub.f32 %v347_v30, %v351_v10  ;;  %v344_v31 = vmul.f32 %v340_v36, %v336_v50  ;;  %v352_v37 = vmul.f32 %v332_v32, %v298_v49  ;;  %v365_v40 = vmul.f32 %v1391_v19, %v979_v0 }
  0x52   :  { %v333_v47 = vadd.f32 %v1323_v53, %v328_v39  ;;  %v341_v25 = vmul.f32 %v337_v24, %v337_v24  ;;  %v320_v48 = vadd.f32 %v316_v26, %v312_v6  ;;  %v1399_v12 = vstv %s1366_s10  ;;  %s1579_s10 = sld [smem:[#allocation3 + $0x20]] }
  0x53   :  { %894 = vst [vmem:[%s2048_s2 + $0x40] sm:$0xff] %v355_v62  ;;  %v348_v18 = vadd.f32 %v344_v31, %v322_v58  ;;  %v370_v41 = vmul.f32 %v984_v1, %v1399_v12  ;;  %v1407_v55 = vstv %s1372_s11  ;;  %v1410_v49 = vstv %s1374_s12  ;;  %s1589_s11 = sld [smem:[#allocation3 + $0x21]]  ;;  %s1601_s12 = sld [smem:[#allocation3 + $0x22]] }
  0x54   :  { %v345_v51 = vmul.f32 %v341_v25, %v337_v24  ;;  %v353_v35 = vmul.f32 %v333_v47, %v299_v42  ;;  %v324_v56 = vadd.f32 %v320_v48, %v1307_v43  ;;  %v379_v60 = vmul.f32 %v989_v2, %v1407_v55 }
  0x55   :  { %v356_v46 = vsub.f32 %v348_v18, %v352_v37  ;;  %v374_v61 = vadd.f32 %v370_v41, %v365_v40  ;;  %v392_v58 = vmul.f32 %v994_v3, %v1391_v19  ;;  %v396_v7 = vmul.f32 %v999_v4, %v1399_v12 }
  0x56   :  { %v349_v63 = vadd.f32 %v345_v51, %v323_v23  ;;  %v329_v10 = vmul.f32 %v1320_v52, %v324_v56  ;;  %v338_v59 = vmax.f32 %v324_v56, 0.0  ;;  %v404_v42 = vmul.f32 %v1004_v5, %v1407_v55 }
  0x57   :  { %895 = vst [vmem:[%s2048_s2 + $0x48] sm:$0xff] %v356_v46  ;;  %v383_v43 = vadd.f32 %v379_v60, %v374_v61  ;;  %v400_v50 = vadd.f32 %v396_v7, %v392_v58  ;;  %v1426_v11 = vstv %s1386_s13  ;;  %v1429_v29 = vstv %s1388_s14  ;;  %s1603_s13 = sld [smem:[#allocation3 + $0x23]] }
  0x58   :  { %v357_v26 = vsub.f32 %v349_v63, %v353_v35  ;;  %v334_v30 = vadd.f32 %v1323_v53, %v329_v10  ;;  %v342_v23 = vmul.f32 %v338_v59, %v338_v59  ;;  %v366_v52 = vmul.f32 %v1391_v19, %v1013_v8 }
  0x59   :  { %v388_v32 = vadd.f32 %v1410_v49, %v383_v43  ;;  %v408_v36 = vadd.f32 %v404_v42, %v400_v50  ;;  %v371_v39 = vmul.f32 %v1018_v9, %v1399_v12  ;;  %v380_v24 = vmul.f32 %v1031_v14, %v1407_v55 }
  0x5a   :  { %896 = vst [vmem:[%s2048_s2 + $0x50] sm:$0xff] %v357_v26  ;;  %v346_v6 = vmul.f32 %v342_v23, %v338_v59  ;;  %v354_v62 = vmul.f32 %v334_v30, %v300_v13  ;;  %v393_v53 = vmul.f32 %v1036_v15, %v1391_v19  ;;  %v397_v31 = vmul.f32 %v1049_v20, %v1399_v12 }
  0x5b   :  { %v412_v37 = vadd.f32 %v408_v36, %v1410_v49  ;;  %v375_v40 = vadd.f32 %v371_v39, %v366_v52  ;;  %v405_v47 = vmul.f32 %v1054_v21, %v1407_v55  ;;  %v367_v25 = vmul.f32 %v1391_v19, %v1059_v22 }
  0x5c   :  { %v350_v48 = vadd.f32 %v346_v6, %v324_v56  ;;  %v401_v18 = vadd.f32 %v397_v31, %v393_v53  ;;  %v372_v13 = vmul.f32 %v1070_v27, %v1399_v12  ;;  %v381_v41 = vmul.f32 %v1075_v28, %v1407_v55 }
  0x5d   :  { %v417_v51 = vmul.f32 %v1426_v11, %v412_v37  ;;  %v426_v35 = vmax.f32 %v412_v37, 0.0  ;;  %v384_v60 = vadd.f32 %v380_v24, %v375_v40  ;;  %v394_v46 = vmul.f32 %v1086_v33, %v1391_v19 }
  0x5e   :  { %v358_v61 = vsub.f32 %v350_v48, %v354_v62  ;;  %v409_v58 = vadd.f32 %v405_v47, %v401_v18  ;;  %v376_v7 = vadd.f32 %v372_v13, %v367_v25  ;;  %v398_v56 = vmul.f32 %v1091_v34, %v1399_v12 }
  0x5f   :  { %v422_v63 = vadd.f32 %v1429_v29, %v417_v51  ;;  %v430_v10 = vmul.f32 %v426_v35, %v426_v35  ;;  %v389_v59 = vadd.f32 %v1410_v49, %v384_v60  ;;  %v406_v42 = vmul.f32 %v1100_v38, %v1407_v55 }
  0x60   :  { %897 = vst [vmem:[%s2048_s2 + $0x58] sm:$0xff] %v358_v61  ;;  %v413_v43 = vadd.f32 %v409_v58, %v1410_v49  ;;  %v385_v50 = vadd.f32 %v381_v41, %v376_v7  ;;  %v402_v26 = vadd.f32 %v398_v56, %v394_v46  ;;  %v368_v30 = vmul.f32 %v1391_v19, %v1111_v44 }
  0x61   :  { %v434_v23 = vmul.f32 %v430_v10, %v426_v35  ;;  %v442_v52 = vmul.f32 %v422_v63, %v388_v32  ;;  %v373_v36 = vmul.f32 %v1116_v45, %v1399_v12  ;;  %v382_v39 = vmul.f32 %v1129_v54, %v1407_v55 }
  0x62   :  { %v418_v24 = vmul.f32 %v1426_v11, %v413_v43  ;;  %v427_v6 = vmax.f32 %v413_v43, 0.0  ;;  %v390_v62 = vadd.f32 %v1410_v49, %v385_v50  ;;  %v410_v53 = vadd.f32 %v406_v42, %v402_v26 }
  0x63   :  { %v438_v31 = vadd.f32 %v434_v23, %v412_v37  ;;  %v377_v40 = vadd.f32 %v373_v36, %v368_v30  ;;  %v395_v32 = vmul.f32 %v1136_v57, %v1391_v19  ;;  %v399_v47 = vmul.f32 %v1150_v16, %v1399_v12 }
  0x64   :  { %v423_v25 = vadd.f32 %v1429_v29, %v418_v24  ;;  %v431_v48 = vmul.f32 %v427_v6, %v427_v6  ;;  %v414_v18 = vadd.f32 %v410_v53, %v1410_v49  ;;  %v407_v13 = vmul.f32 %v1155_v17, %v1407_v55 }
  0x65   :  { %v446_v37 = vsub.f32 %v438_v31, %v442_v52  ;;  %v386_v41 = vadd.f32 %v382_v39, %v377_v40  ;;  %v403_v51 = vadd.f32 %v399_v47, %v395_v32  ;;  %v1497_v19 = vstv %s1458_s18  ;;  %s1678_s18 = sld [smem:[#allocation3 + $0x25]] }
  0x66   :  { %v435_v12 = vmul.f32 %v431_v48, %v427_v6  ;;  %v443_v35 = vmul.f32 %v423_v25, %v389_v59  ;;  %v419_v60 = vmul.f32 %v1426_v11, %v414_v18  ;;  %v428_v46 = vmax.f32 %v414_v18, 0.0 }
  0x67   :  { %898 = vst [vmem:[%s2048_s2 + $0x60] sm:$0xff] %v446_v37  ;;  %v391_v55 = vadd.f32 %v1410_v49, %v386_v41  ;;  %v411_v61 = vadd.f32 %v407_v13, %v403_v51  ;;  %v456_v58 = vmul.f32 %v1497_v19, %v979_v0  ;;  %v1507_v7 = vstv %s1466_s19 }
  0x68   :  { %v439_v56 = vadd.f32 %v435_v12, %v413_v43  ;;  %v424_v63 = vadd.f32 %v1429_v29, %v419_v60  ;;  %v432_v10 = vmul.f32 %v428_v46, %v428_v46  ;;  %v461_v59 = vmul.f32 %v984_v1, %v1507_v7 }
  0x69   :  { %v415_v42 = vadd.f32 %v411_v61, %v1410_v49  ;;  %v1514_v50 = vstv %s1478_s24  ;;  %v1517_v26 = vstv %s1480_s25  ;;  %v483_v30 = vmul.f32 %v994_v3, %v1497_v19  ;;  %s1692_s24 = sld [smem:[#allocation3 + $0x27]]  ;;  %s1704_s25 = sld [smem:[#allocation3 + $0x28]] }
  0x6a   :  { %v447_v23 = vsub.f32 %v439_v56, %v443_v35  ;;  %v436_v52 = vmul.f32 %v432_v10, %v428_v46  ;;  %v444_v43 = vmul.f32 %v424_v63, %v390_v62  ;;  %v465_v36 = vadd.f32 %v461_v59, %v456_v58 }
  0x6b   :  { %v420_v39 = vmul.f32 %v1426_v11, %v415_v42  ;;  %v429_v24 = vmax.f32 %v415_v42, 0.0  ;;  %v470_v6 = vmul.f32 %v989_v2, %v1514_v50  ;;  %v487_v49 = vmul.f32 %v999_v4, %v1507_v7 }
  0x6c   :  { %899 = vst [vmem:[%s2048_s2 + $0x68] sm:$0xff] %v447_v23  ;;  %v440_v53 = vadd.f32 %v436_v52, %v414_v18  ;;  %v495_v31 = vmul.f32 %v1004_v5, %v1514_v50  ;;  %v1532_v40 = vstv %s1492_s26  ;;  %v1535_v62 = vstv %s1494_s27  ;;  %s1706_s26 = sld [smem:[#allocation3 + $0x29]] }
  0x6d   :  { %v425_v11 = vadd.f32 %v1429_v29, %v420_v39  ;;  %v433_v32 = vmul.f32 %v429_v24, %v429_v24  ;;  %v474_v47 = vadd.f32 %v470_v6, %v465_v36  ;;  %v491_v25 = vadd.f32 %v487_v49, %v483_v30 }
  0x6e   :  { %v448_v48 = vsub.f32 %v440_v53, %v444_v43  ;;  %v457_v13 = vmul.f32 %v1497_v19, %v1013_v8  ;;  %v462_v37 = vmul.f32 %v1018_v9, %v1507_v7  ;;  %v471_v18 = vmul.f32 %v1031_v14, %v1514_v50 }
  0x6f   :  { %v437_v41 = vmul.f32 %v433_v32, %v429_v24  ;;  %v445_v51 = vmul.f32 %v425_v11, %v391_v55  ;;  %v479_v12 = vadd.f32 %v1517_v26, %v474_v47  ;;  %v499_v35 = vadd.f32 %v495_v31, %v491_v25 }
  0x70   :  { %900 = vst [vmem:[%s2048_s2 + $0x70] sm:$0xff] %v448_v48  ;;  %v466_v29 = vadd.f32 %v462_v37, %v457_v13  ;;  %v484_v60 = vmul.f32 %v1036_v15, %v1497_v19  ;;  %v488_v46 = vmul.f32 %v1049_v20, %v1507_v7  ;;  %v496_v61 = vmul.f32 %v1054_v21, %v1514_v50 }
  0x71   :  { %v441_v58 = vadd.f32 %v437_v41, %v415_v42  ;;  %v503_v55 = vadd.f32 %v499_v35, %v1517_v26  ;;  %v458_v56 = vmul.f32 %v1497_v19, %v1059_v22  ;;  %v463_v63 = vmul.f32 %v1070_v27, %v1507_v7 }
  0x72   :  { %v475_v10 = vadd.f32 %v471_v18, %v466_v29  ;;  %v492_v59 = vadd.f32 %v488_v46, %v484_v60  ;;  %v472_v30 = vmul.f32 %v1075_v28, %v1514_v50  ;;  %v485_v23 = vmul.f32 %v1086_v33, %v1497_v19 }
  0x73   :  { %v449_v52 = vsub.f32 %v441_v58, %v445_v51  ;;  %v508_v42 = vmul.f32 %v1532_v40, %v503_v55  ;;  %v517_v43 = vmax.f32 %v503_v55, 0.0  ;;  %v467_v36 = vadd.f32 %v463_v63, %v458_v56 }
  0x74   :  { %v480_v39 = vadd.f32 %v1517_v26, %v475_v10  ;;  %v500_v24 = vadd.f32 %v496_v61, %v492_v59  ;;  %v489_v6 = vmul.f32 %v1091_v34, %v1507_v7  ;;  %v497_v49 = vmul.f32 %v1100_v38, %v1514_v50 }
  0x75   :  { %901 = vst [vmem:[%s2048_s2 + $0x78] sm:$0xff] %v449_v52  ;;  %v513_v53 = vadd.f32 %v1535_v62, %v508_v42  ;;  %v521_v31 = vmul.f32 %v517_v43, %v517_v43  ;;  %v476_v11 = vadd.f32 %v472_v30, %v467_v36  ;;  %v459_v32 = vmul.f32 %v1497_v19, %v1111_v44 }
  0x76   :  { %v504_v47 = vadd.f32 %v500_v24, %v1517_v26  ;;  %v493_v25 = vadd.f32 %v489_v6, %v485_v23  ;;  %v464_v48 = vmul.f32 %v1116_v45, %v1507_v7  ;;  %v473_v13 = vmul.f32 %v1129_v54, %v1514_v50 }
  0x77   :  { %v525_v37 = vmul.f32 %v521_v31, %v517_v43  ;;  %v533_v18 = vmul.f32 %v513_v53, %v479_v12  ;;  %v481_v41 = vadd.f32 %v1517_v26, %v476_v11  ;;  %v486_v51 = vmul.f32 %v1136_v57, %v1497_v19 }
  0x78   :  { %v509_v35 = vmul.f32 %v1532_v40, %v504_v47  ;;  %v518_v29 = vmax.f32 %v504_v47, 0.0  ;;  %v501_v60 = vadd.f32 %v497_v49, %v493_v25  ;;  %v468_v46 = vadd.f32 %v464_v48, %v459_v32 }
  0x79   :  { %v529_v61 = vadd.f32 %v525_v37, %v503_v55  ;;  %v490_v58 = vmul.f32 %v1150_v16, %v1507_v7  ;;  %v498_v12 = vmul.f32 %v1155_v17, %v1514_v50  ;;  %v1597_v56 = vstv %s1559_s6 }
  0x7a   :  { %v514_v63 = vadd.f32 %v1535_v62, %v509_v35  ;;  %v522_v19 = vmul.f32 %v518_v29, %v518_v29  ;;  %v505_v10 = vadd.f32 %v501_v60, %v1517_v26  ;;  %v477_v59 = vadd.f32 %v473_v13, %v468_v46 }
  0x7b   :  { %v537_v55 = vsub.f32 %v529_v61, %v533_v18  ;;  %v494_v30 = vadd.f32 %v490_v58, %v486_v51  ;;  %v547_v7 = vmul.f32 %v1597_v56, %v979_v0  ;;  %v1608_v23 = vstv %s1566_s7 }
  0x7c   :  { %v526_v50 = vmul.f32 %v522_v19, %v518_v29  ;;  %v534_v52 = vmul.f32 %v514_v63, %v480_v39  ;;  %v510_v42 = vmul.f32 %v1532_v40, %v505_v10  ;;  %v519_v43 = vmax.f32 %v505_v10, 0.0 }
  0x7d   :  { %902 = vst [vmem:[%s2048_s2 + $0x80] sm:$0xff] %v537_v55  ;;  %v482_v36 = vadd.f32 %v1517_v26, %v477_v59  ;;  %v502_v24 = vadd.f32 %v498_v12, %v494_v30  ;;  %v552_v6 = vmul.f32 %v984_v1, %v1608_v23  ;;  %v1618_v49 = vstv %s1579_s10 }
  0x7e   :  { %v530_v0 = vadd.f32 %v526_v50, %v504_v47  ;;  %v515_v53 = vadd.f32 %v1535_v62, %v510_v42  ;;  %v523_v31 = vmul.f32 %v519_v43, %v519_v43  ;;  %v561_v39 = vmul.f32 %v989_v2, %v1618_v49 }
  0x7f   :  { %v506_v11 = vadd.f32 %v502_v24, %v1517_v26  ;;  %v556_v32 = vadd.f32 %v552_v6, %v547_v7  ;;  %v1625_v25 = vstv %s1589_s11  ;;  %v574_v48 = vmul.f32 %v994_v3, %v1597_v56 }
  0x80   :  { %v538_v1 = vsub.f32 %v530_v0, %v534_v52  ;;  %v527_v13 = vmul.f32 %v523_v31, %v519_v43  ;;  %v535_v37 = vmul.f32 %v515_v53, %v481_v41  ;;  %v578_v47 = vmul.f32 %v999_v4, %v1608_v23 }
  0x81   :  { %v511_v18 = vmul.f32 %v1532_v40, %v506_v11  ;;  %v520_v51 = vmax.f32 %v506_v11, 0.0  ;;  %v565_v2 = vadd.f32 %v561_v39, %v556_v32  ;;  %v586_v26 = vmul.f32 %v1004_v5, %v1618_v49 }
  0x82   :  { %903 = vst [vmem:[%s2048_s2 + $0x88] sm:$0xff] %v538_v1  ;;  %v531_v35 = vadd.f32 %v527_v13, %v505_v10  ;;  %v582_v29 = vadd.f32 %v578_v47, %v574_v48  ;;  %v1638_v3 = vstv %s1601_s12  ;;  %v1641_v60 = vstv %s1603_s13 }
  0x83   :  { %v516_v41 = vadd.f32 %v1535_v62, %v511_v18  ;;  %v524_v4 = vmul.f32 %v520_v51, %v520_v51  ;;  %v570_v40 = vadd.f32 %v1625_v25, %v565_v2  ;;  %v548_v46 = vmul.f32 %v1597_v56, %v1013_v8 }
  0x84   :  { %v539_v61 = vsub.f32 %v531_v35, %v535_v37  ;;  %v590_v5 = vadd.f32 %v586_v26, %v582_v29  ;;  %v553_v58 = vmul.f32 %v1018_v9, %v1608_v23  ;;  %v562_v12 = vmul.f32 %v1031_v14, %v1618_v49 }
  0x85   :  { %v528_v63 = vmul.f32 %v524_v4, %v520_v51  ;;  %v536_v19 = vmul.f32 %v516_v41, %v482_v36  ;;  %v575_v10 = vmul.f32 %v1036_v15, %v1597_v56  ;;  %v579_v62 = vmul.f32 %v1049_v20, %v1608_v23  ;;  %v1719_v4 = vld [vmem:[%s2047_s1] sm:$0xff] }
  0x86   :  { %904 = vst [vmem:[%s2048_s2 + $0x90] sm:$0xff] %v539_v61  ;;  %v594_v8 = vadd.f32 %v590_v5, %v1625_v25  ;;  %v557_v59 = vadd.f32 %v553_v58, %v548_v46  ;;  %v587_v9 = vmul.f32 %v1054_v21, %v1618_v49  ;;  %v549_v14 = vmul.f32 %v1597_v56, %v1059_v22 }
  0x87   :  { %v532_v55 = vadd.f32 %v528_v63, %v506_v11  ;;  %v583_v30 = vadd.f32 %v579_v62, %v575_v10  ;;  %v554_v15 = vmul.f32 %v1070_v27, %v1608_v23  ;;  %v563_v20 = vmul.f32 %v1075_v28, %v1618_v49 }
  0x88   :  { %v599_v7 = vmul.f32 %v1638_v3, %v594_v8  ;;  %v608_v50 = vmax.f32 %v594_v8, 0.0  ;;  %v566_v52 = vadd.f32 %v562_v12, %v557_v59  ;;  %v576_v42 = vmul.f32 %v1086_v33, %v1597_v56  ;;  %v1730_v12 = vld [vmem:[%s2047_s1 + $0x20] sm:$0xff] }
  0x89   :  { %v540_v21 = vsub.f32 %v532_v55, %v536_v19  ;;  %v591_v43 = vadd.f32 %v587_v9, %v583_v30  ;;  %v558_v22 = vadd.f32 %v554_v15, %v549_v14  ;;  %v580_v36 = vmul.f32 %v1091_v34, %v1608_v23 }
  0x8a   :  { %v604_v27 = vadd.f32 %v1641_v60, %v599_v7  ;;  %v612_v24 = vmul.f32 %v608_v50, %v608_v50  ;;  %v571_v28 = vadd.f32 %v1625_v25, %v566_v52  ;;  %v588_v6 = vmul.f32 %v1100_v38, %v1618_v49 }
  0x8b   :  { %905 = vst [vmem:[%s2048_s2 + $0x98] sm:$0xff] %v540_v21  ;;  %v595_v33 = vadd.f32 %v591_v43, %v1625_v25  ;;  %v567_v0 = vadd.f32 %v563_v20, %v558_v22  ;;  %v584_v53 = vadd.f32 %v580_v36, %v576_v42  ;;  %v550_v34 = vmul.f32 %v1597_v56, %v1111_v44  ;;  %v1752_v20 = vld [vmem:[%s2047_s1 + $0x40] sm:$0xff] }
  0x8c   :  { %v616_v31 = vmul.f32 %v612_v24, %v608_v50  ;;  %v624_v39 = vmul.f32 %v604_v27, %v570_v40  ;;  %v555_v11 = vmul.f32 %v1116_v45, %v1608_v23  ;;  %v564_v38 = vmul.f32 %v1129_v54, %v1618_v49  ;;  %v1759_v50 = vld [vmem:[%s2047_s1 + $0x80] sm:$0xff] }
  0x8d   :  { %v600_v32 = vmul.f32 %v1638_v3, %v595_v33  ;;  %v609_v48 = vmax.f32 %v595_v33, 0.0  ;;  %v572_v1 = vadd.f32 %v1625_v25, %v567_v0  ;;  %v592_v13 = vadd.f32 %v588_v6, %v584_v53  ;;  %v1769_v42 = vld [vmem:[%s2047_s1 + $0xa0] sm:$0xff]  ;;  %v1790_v53 = vld [vmem:[%s2047_s1 + $0x28] sm:$0xff] }
  0x8e   :  { %v620_v44 = vadd.f32 %v616_v31, %v594_v8  ;;  %v559_v37 = vadd.f32 %v555_v11, %v550_v34  ;;  %v577_v47 = vmul.f32 %v1136_v57, %v1597_v56  ;;  %v581_v45 = vmul.f32 %v1150_v16, %v1608_v23  ;;  %v1744_v8 = vld [vmem:[%s2047_s1 + $0x60] sm:$0xff]  ;;  %v1797_v34 = vld [vmem:[%s2047_s1 + $0x48] sm:$0xff] }
  0x8f   :  { %v605_v54 = vadd.f32 %v1641_v60, %v600_v32  ;;  %v613_v18 = vmul.f32 %v609_v48, %v609_v48  ;;  %v596_v51 = vadd.f32 %v592_v13, %v1625_v25  ;;  %v589_v2 = vmul.f32 %v1155_v17, %v1618_v49 }
  0x90   :  { %v628_v26 = vsub.f32 %v620_v44, %v624_v39  ;;  %v568_v35 = vadd.f32 %v564_v38, %v559_v37  ;;  %v585_v29 = vadd.f32 %v581_v45, %v577_v47  ;;  %v1709_v57 = vstv %s1670_s21  ;;  %v1815_v44 = vld [vmem:[%s2047_s1 + $0x88] sm:$0xff] }
  0x91   :  { %v617_v56 = vmul.f32 %v613_v18, %v609_v48  ;;  %v625_v16 = vmul.f32 %v605_v54, %v571_v28  ;;  %v601_v23 = vmul.f32 %v1638_v3, %v596_v51  ;;  %v610_v41 = vmax.f32 %v596_v51, 0.0  ;;  %v1822_v47 = vld [vmem:[%s2047_s1 + $0xa8] sm:$0xff] }
  0x92   :  { %906 = vst [vmem:[%s2048_s2 + $0xa0] sm:$0xff] %v628_v26  ;;  %v573_v17 = vadd.f32 %v1625_v25, %v568_v35  ;;  %v593_v49 = vadd.f32 %v589_v2, %v585_v29  ;;  %v638_v40 = vmul.f32 %v1719_v4, %v1709_v57  ;;  %v1724_v46 = vstv %s1678_s18  ;;  %v1837_v26 = vld [vmem:[%s2047_s1 + $0x30] sm:$0xff] }
  0x93   :  { %v621_v61 = vadd.f32 %v617_v56, %v595_v33  ;;  %v606_v5 = vadd.f32 %v1641_v60, %v601_v23  ;;  %v614_v58 = vmul.f32 %v610_v41, %v610_v41  ;;  %v643_v63 = vmul.f32 %v1730_v12, %v1724_v46  ;;  %v1783_v33 = vld [vmem:[%s2047_s1 + $0x8] sm:$0xff] }
  0x94   :  { %v597_v19 = vadd.f32 %v593_v49, %v1625_v25  ;;  %v1736_v10 = vstv %s1690_s23  ;;  %v1739_v62 = vstv %s1692_s24  ;;  %v665_v59 = vmul.f32 %v1744_v8, %v1709_v57  ;;  %s1911_s24 = sld [smem:[#allocation3 + $0x2d]] }
  0x95   :  { %v629_v9 = vsub.f32 %v621_v61, %v625_v16  ;;  %v618_v14 = vmul.f32 %v614_v58, %v610_v41  ;;  %v626_v55 = vmul.f32 %v606_v5, %v572_v1  ;;  %v647_v30 = vadd.f32 %v643_v63, %v638_v40  ;;  %v1808_v1 = vld [vmem:[%s2047_s1 + $0x68] sm:$0xff]  ;;  %v1846_v16 = vld [vmem:[%s2047_s1 + $0x50] sm:$0xff] }
  0x96   :  { %v602_v25 = vmul.f32 %v1638_v3, %v597_v19  ;;  %v611_v15 = vmax.f32 %v597_v19, 0.0  ;;  %v652_v7 = vmul.f32 %v1752_v20, %v1736_v10  ;;  %v669_v52 = vmul.f32 %v1759_v50, %v1724_v46  ;;  %v1853_v41 = vld [vmem:[%s2047_s1 + $0x70] sm:$0xff] }
  0x97   :  { %907 = vst [vmem:[%s2048_s2 + $0xa8] sm:$0xff] %v629_v9  ;;  %v622_v3 = vadd.f32 %v618_v14, %v596_v51  ;;  %v677_v21 = vmul.f32 %v1769_v42, %v1736_v10  ;;  %v1774_v43 = vstv %s1704_s25  ;;  %v1777_v22 = vstv %s1706_s26  ;;  %v1830_v51 = vld [vmem:[%s2047_s1 + $0x10] sm:$0xff] }
  0x98   :  { %v607_v36 = vadd.f32 %v1641_v60, %v602_v25  ;;  %v615_v27 = vmul.f32 %v611_v15, %v611_v15  ;;  %v656_v24 = vadd.f32 %v652_v7, %v647_v30  ;;  %v673_v28 = vadd.f32 %v669_v52, %v665_v59  ;;  %v1871_v9 = vld [vmem:[%s2047_s1 + $0xb0] sm:$0xff] }
  0x99   :  { %v630_v6 = vsub.f32 %v622_v3, %v626_v55  ;;  %v639_v0 = vmul.f32 %v1783_v33, %v1709_v57  ;;  %v644_v60 = vmul.f32 %v1790_v53, %v1724_v46  ;;  %v653_v31 = vmul.f32 %v1797_v34, %v1736_v10 }
  0x9a   :  { %v619_v39 = vmul.f32 %v615_v27, %v611_v15  ;;  %v627_v11 = vmul.f32 %v607_v36, %v573_v17  ;;  %v661_v38 = vadd.f32 %v1739_v62, %v656_v24  ;;  %v681_v32 = vadd.f32 %v677_v21, %v673_v28  ;;  %v1882_v15 = vld [vmem:[%s2047_s1 + $0x18] sm:$0xff] }
  0x9b   :  { %908 = vst [vmem:[%s2048_s2 + $0xb0] sm:$0xff] %v630_v6  ;;  %v648_v48 = vadd.f32 %v644_v60, %v639_v0  ;;  %v666_v13 = vmul.f32 %v1808_v1, %v1709_v57  ;;  %v670_v37 = vmul.f32 %v1815_v44, %v1724_v46  ;;  %v678_v45 = vmul.f32 %v1822_v47, %v1736_v10  ;;  %v1892_v21 = vld [vmem:[%s2047_s1 + $0x38] sm:$0xff] }
  0x9c   :  { %v623_v54 = vadd.f32 %v619_v39, %v597_v19  ;;  %v685_v18 = vadd.f32 %v681_v32, %v1739_v62  ;;  %v640_v2 = vmul.f32 %v1830_v51, %v1709_v57  ;;  %v645_v35 = vmul.f32 %v1837_v26, %v1724_v46  ;;  %v1864_v19 = vld [vmem:[%s2047_s1 + $0x90] sm:$0xff]  ;;  %v1899_v27 = vld [vmem:[%s2047_s1 + $0x58] sm:$0xff] }
  0x9d   :  { %v657_v29 = vadd.f32 %v653_v31, %v648_v48  ;;  %v674_v56 = vadd.f32 %v670_v37, %v666_v13  ;;  %v654_v23 = vmul.f32 %v1846_v16, %v1736_v10  ;;  %v667_v17 = vmul.f32 %v1853_v41, %v1709_v57  ;;  %v1907_v60 = vld [vmem:[%s2047_s1 + $0x78] sm:$0xff] }
  0x9e   :  { %v631_v49 = vsub.f32 %v623_v54, %v627_v11  ;;  %v690_v40 = vmul.f32 %v1774_v43, %v685_v18  ;;  %v699_v61 = vmax.f32 %v685_v18, 0.0  ;;  %v649_v5 = vadd.f32 %v645_v35, %v640_v2 }
  0x9f   :  { %v662_v58 = vadd.f32 %v1739_v62, %v657_v29  ;;  %v682_v63 = vadd.f32 %v678_v45, %v674_v56  ;;  %v671_v59 = vmul.f32 %v1864_v19, %v1724_v46  ;;  %v679_v14 = vmul.f32 %v1871_v9, %v1736_v10 }
  0xa0   :  { %909 = vst [vmem:[%s2048_s2 + $0xb8] sm:$0xff] %v631_v49  ;;  %v695_v55 = vadd.f32 %v1777_v22, %v690_v40  ;;  %v703_v30 = vmul.f32 %v699_v61, %v699_v61  ;;  %v658_v25 = vadd.f32 %v654_v23, %v649_v5  ;;  %v641_v7 = vmul.f32 %v1882_v15, %v1709_v57 }
  0xa1   :  { %v686_v52 = vadd.f32 %v682_v63, %v1739_v62  ;;  %v675_v3 = vadd.f32 %v671_v59, %v667_v17  ;;  %v646_v36 = vmul.f32 %v1892_v21, %v1724_v46  ;;  %v655_v24 = vmul.f32 %v1899_v27, %v1736_v10 }
  0xa2   :  { %v707_v28 = vmul.f32 %v703_v30, %v699_v61  ;;  %v715_v6 = vmul.f32 %v695_v55, %v661_v38  ;;  %v663_v0 = vadd.f32 %v1739_v62, %v658_v25  ;;  %v668_v31 = vmul.f32 %v1907_v60, %v1709_v57  ;;  %v1917_v38 = vld [vmem:[%s2047_s1 + $0x98] sm:$0xff] }
  0xa3   :  { %v691_v39 = vmul.f32 %v1774_v43, %v686_v52  ;;  %v700_v11 = vmax.f32 %v686_v52, 0.0  ;;  %v683_v32 = vadd.f32 %v679_v14, %v675_v3  ;;  %v650_v48 = vadd.f32 %v646_v36, %v641_v7  ;;  %v1924_v57 = vld [vmem:[%s2047_s1 + $0xb8] sm:$0xff] }
  0xa4   :  { %v711_v13 = vadd.f32 %v707_v28, %v685_v18  ;;  %v672_v37 = vmul.f32 %v1917_v38, %v1724_v46  ;;  %v680_v45 = vmul.f32 %v1924_v57, %v1736_v10  ;;  %v1929_v54 = vstv %s1841_s4 }
  0xa5   :  { %v696_v18 = vadd.f32 %v1777_v22, %v691_v39  ;;  %v704_v2 = vmul.f32 %v700_v11, %v700_v11  ;;  %v687_v35 = vadd.f32 %v683_v32, %v1739_v62  ;;  %v659_v29 = vadd.f32 %v655_v24, %v650_v48 }
  0xa6   :  { %v719_v46 = vsub.f32 %v711_v13, %v715_v6  ;;  %v676_v56 = vadd.f32 %v672_v37, %v668_v31  ;;  %v729_v23 = vmul.f32 %v1719_v4, %v1929_v54  ;;  %v1940_v17 = vstv %s1858_s9 }
  0xa7   :  { %v708_v10 = vmul.f32 %v704_v2, %v700_v11  ;;  %v716_v49 = vmul.f32 %v696_v18, %v662_v58  ;;  %v692_v40 = vmul.f32 %v1774_v43, %v687_v35  ;;  %v701_v61 = vmax.f32 %v687_v35, 0.0 }
  0xa8   :  { %910 = vst [vmem:[%s2048_s2 + $0xc0] sm:$0xff] %v719_v46  ;;  %v664_v5 = vadd.f32 %v1739_v62, %v659_v29  ;;  %v684_v63 = vadd.f32 %v680_v45, %v676_v56  ;;  %v734_v59 = vmul.f32 %v1730_v12, %v1940_v17  ;;  %v1950_v14 = vstv %s1886_s0 }
  0xa9   :  { %v712_v4 = vadd.f32 %v708_v10, %v686_v52  ;;  %v697_v55 = vadd.f32 %v1777_v22, %v692_v40  ;;  %v705_v30 = vmul.f32 %v701_v61, %v701_v61  ;;  %v743_v58 = vmul.f32 %v1752_v20, %v1950_v14 }
  0xaa   :  { %v688_v25 = vadd.f32 %v684_v63, %v1739_v62  ;;  %v738_v7 = vadd.f32 %v734_v59, %v729_v23  ;;  %v1957_v3 = vstv %s1911_s24  ;;  %v756_v36 = vmul.f32 %v1744_v8, %v1929_v54 }
  0xab   :  { %v720_v12 = vsub.f32 %v712_v4, %v716_v49  ;;  %v709_v24 = vmul.f32 %v705_v30, %v701_v61  ;;  %v717_v28 = vmul.f32 %v697_v55, %v663_v0  ;;  %v760_v52 = vmul.f32 %v1759_v50, %v1940_v17 }
  0xac   :  { %v693_v6 = vmul.f32 %v1774_v43, %v688_v25  ;;  %v702_v31 = vmax.f32 %v688_v25, 0.0  ;;  %v747_v20 = vadd.f32 %v743_v58, %v738_v7  ;;  %v768_v62 = vmul.f32 %v1769_v42, %v1950_v14 }
  0xad   :  { %911 = vst [vmem:[%s2048_s2 + $0xc8] sm:$0xff] %v720_v12  ;;  %v713_v39 = vadd.f32 %v709_v24, %v687_v35  ;;  %v764_v11 = vadd.f32 %v760_v52, %v756_v36  ;;  %v1970_v8 = vstv %s1933_s29  ;;  %v1973_v32 = vstv %s1935_s30 }
  0xae   :  { %v698_v0 = vadd.f32 %v1777_v22, %v693_v6  ;;  %v706_v50 = vmul.f32 %v702_v31, %v702_v31  ;;  %v752_v43 = vadd.f32 %v1957_v3, %v747_v20  ;;  %v730_v48 = vmul.f32 %v1783_v33, %v1929_v54 }
  0xaf   :  { %v721_v13 = vsub.f32 %v713_v39, %v717_v28  ;;  %v772_v42 = vadd.f32 %v768_v62, %v764_v11  ;;  %v735_v37 = vmul.f32 %v1790_v53, %v1940_v17  ;;  %v744_v45 = vmul.f32 %v1797_v34, %v1950_v14 }
  0xb0   :  { %v710_v18 = vmul.f32 %v706_v50, %v702_v31  ;;  %v718_v2 = vmul.f32 %v698_v0, %v664_v5  ;;  %v757_v35 = vmul.f32 %v1808_v1, %v1929_v54  ;;  %v761_v22 = vmul.f32 %v1815_v44, %v1940_v17 }
  0xb1   :  { %912 = vst [vmem:[%s2048_s2 + $0xd0] sm:$0xff] %v721_v13  ;;  %v776_v33 = vadd.f32 %v772_v42, %v1957_v3  ;;  %v739_v29 = vadd.f32 %v735_v37, %v730_v48  ;;  %v769_v53 = vmul.f32 %v1822_v47, %v1950_v14  ;;  %v731_v34 = vmul.f32 %v1830_v51, %v1929_v54 }
  0xb2   :  { %v714_v46 = vadd.f32 %v710_v18, %v688_v25  ;;  %v765_v56 = vadd.f32 %v761_v22, %v757_v35  ;;  %v736_v1 = vmul.f32 %v1837_v26, %v1940_v17  ;;  %v745_v44 = vmul.f32 %v1846_v16, %v1950_v14 }
  0xb3   :  { %v781_v23 = vmul.f32 %v1970_v8, %v776_v33  ;;  %v790_v10 = vmax.f32 %v776_v33, 0.0  ;;  %v748_v49 = vadd.f32 %v744_v45, %v739_v29  ;;  %v758_v40 = vmul.f32 %v1853_v41, %v1929_v54 }
  0xb4   :  { %v722_v61 = vsub.f32 %v714_v46, %v718_v2  ;;  %v773_v47 = vadd.f32 %v769_v53, %v765_v56  ;;  %v740_v5 = vadd.f32 %v736_v1, %v731_v34  ;;  %v762_v51 = vmul.f32 %v1864_v19, %v1940_v17 }
  0xb5   :  { %v786_v63 = vadd.f32 %v1973_v32, %v781_v23  ;;  %v794_v59 = vmul.f32 %v790_v10, %v790_v10  ;;  %v770_v26 = vmul.f32 %v1871_v9, %v1950_v14  ;;  %v753_v16 = vadd.f32 %v1957_v3, %v748_v49 }
  0xb6   :  { %913 = vst [vmem:[%s2048_s2 + $0xd8] sm:$0xff] %v722_v61  ;;  %v777_v41 = vadd.f32 %v773_v47, %v1957_v3  ;;  %v766_v4 = vadd.f32 %v762_v51, %v758_v40  ;;  %v732_v55 = vmul.f32 %v1882_v15, %v1929_v54  ;;  %v749_v58 = vadd.f32 %v745_v44, %v740_v5 }
  0xb7   :  { %v798_v30 = vmul.f32 %v794_v59, %v790_v10  ;;  %v806_v19 = vmul.f32 %v786_v63, %v752_v43  ;;  %v737_v25 = vmul.f32 %v1892_v21, %v1940_v17  ;;  %v746_v12 = vmul.f32 %v1899_v27, %v1950_v14 }
  0xb8   :  { %v782_v9 = vmul.f32 %v1970_v8, %v777_v41  ;;  %v791_v7 = vmax.f32 %v777_v41, 0.0  ;;  %v774_v36 = vadd.f32 %v770_v26, %v766_v4  ;;  %v759_v52 = vmul.f32 %v1907_v60, %v1929_v54 }
  0xb9   :  { %v802_v24 = vadd.f32 %v798_v30, %v776_v33  ;;  %v741_v28 = vadd.f32 %v737_v25, %v732_v55  ;;  %v763_v15 = vmul.f32 %v1917_v38, %v1940_v17  ;;  %v771_v20 = vmul.f32 %v1924_v57, %v1950_v14 }
  0xba   :  { %v787_v6 = vadd.f32 %v1973_v32, %v782_v9  ;;  %v795_v31 = vmul.f32 %v791_v7, %v791_v7  ;;  %v778_v21 = vadd.f32 %v774_v36, %v1957_v3  ;;  %v754_v39 = vadd.f32 %v1957_v3, %v749_v58 }
  0xbb   :  { %v810_v62 = vsub.f32 %v802_v24, %v806_v19  ;;  %v767_v27 = vadd.f32 %v763_v15, %v759_v52  ;;  %v750_v38 = vadd.f32 %v746_v12, %v741_v28 }
  0xbc   :  { %v799_v11 = vmul.f32 %v795_v31, %v791_v7  ;;  %v807_v0 = vmul.f32 %v787_v6, %v753_v16  ;;  %v783_v50 = vmul.f32 %v1970_v8, %v778_v21  ;;  %v792_v60 = vmax.f32 %v778_v21, 0.0 }
  0xbd   :  { %914 = vst [vmem:[%s2048_s2 + $0xe0] sm:$0xff] %v810_v62  ;;  %v775_v54 = vadd.f32 %v771_v20, %v767_v27  ;;  %v755_v37 = vadd.f32 %v1957_v3, %v750_v38 }
  0xbe   :  { %v803_v17 = vadd.f32 %v799_v11, %v777_v41  ;;  %v788_v43 = vadd.f32 %v1973_v32, %v783_v50  ;;  %v796_v48 = vmul.f32 %v792_v60, %v792_v60 }
  0xbf   :  { %v779_v57 = vadd.f32 %v775_v54, %v1957_v3 }
  0xc0   :  { %v811_v14 = vsub.f32 %v803_v17, %v807_v0  ;;  %v800_v13 = vmul.f32 %v796_v48, %v792_v60  ;;  %v808_v42 = vmul.f32 %v788_v43, %v754_v39 }
  0xc1   :  { %v784_v45 = vmul.f32 %v1970_v8, %v779_v57  ;;  %v793_v18 = vmax.f32 %v779_v57, 0.0 }
  0xc2   :  { %915 = vst [vmem:[%s2048_s2 + $0xe8] sm:$0xff] %v811_v14  ;;  %v804_v2 = vadd.f32 %v800_v13, %v778_v21 }
  0xc3   :  { %v789_v35 = vadd.f32 %v1973_v32, %v784_v45  ;;  %v797_v22 = vmul.f32 %v793_v18, %v793_v18 }
  0xc4   :  { %v812_v33 = vsub.f32 %v804_v2, %v808_v42 }
  0xc5   :  { %v801_v29 = vmul.f32 %v797_v22, %v793_v18  ;;  %v809_v53 = vmul.f32 %v789_v35, %v755_v37 }
  0xc6   :  { %916 = vst [vmem:[%s2048_s2 + $0xf0] sm:$0xff] %v812_v33 }
  0xc7   :  { %v805_v34 = vadd.f32 %v801_v29, %v779_v57 }
  0xc9   :  { %v813_v3 = vsub.f32 %v805_v34, %v809_v53 }
  0xcb   :  { %917 = vst [vmem:[%s2048_s2 + $0xf8] sm:$0xff] %v813_v3 }

</bundles_post_ra>
